<compile_context>
chip_gen: v5e
topology: v5e:2x2
jax: 0.10.0
libtpu: 0.0.40
codegen_flags: <defaults>
</compile_context>

<pallas_src>
import functools

import jax
import jax.numpy as jnp
from jax.experimental import pallas as pl
from jax.experimental.pallas import tpu as pltpu

NEG_SLOPE = 0.01  # nn.LeakyReLU() default


def _leaky_relu(x):
    return jnp.where(x > 0, x, NEG_SLOPE * x)


def _round_up(x, m):
    return ((x + m - 1) // m) * m


# ------------------------------ Pallas kernel ------------------------------ #
def radialgan_pair_kernel(
    gen_idx_ref, map_idx_ref, use_map_ref,          # scalar prefetch (SMEM)
    x_ref,                                          # [Bp, Lp] noise block
    wg1_ref, bg1_ref, wg2_ref, bg2_ref, wg3_ref, bg3_ref,   # generator slabs
    wm1_ref, bm1_ref, wm2_ref, bm2_ref, wm3_ref, bm3_ref,   # mapper slabs
    o_ref,                                          # [Bp, Fp] output block
):
    i = pl.program_id(0)

    # Generator MLP: latent -> H -> H -> features (LeakyReLU on hidden layers).
    h = jnp.dot(x_ref[...], wg1_ref[...], preferred_element_type=jnp.float32)
    h = _leaky_relu(h + bg1_ref[...])
    h = jnp.dot(h, wg2_ref[...], preferred_element_type=jnp.float32)
    h = _leaky_relu(h + bg2_ref[...])
    g = jnp.dot(h, wg3_ref[...], preferred_element_type=jnp.float32) + bg3_ref[...]

    use_map = use_map_ref[i]

    @pl.when(use_map == 0)
    def _():
        o_ref[...] = g.astype(o_ref.dtype)

    @pl.when(use_map != 0)
    def _():
        # Mapper MLP (fused): features -> H -> H -> features.
        m = jnp.dot(g, wm1_ref[...], preferred_element_type=jnp.float32)
        m = _leaky_relu(m + bm1_ref[...])
        m = jnp.dot(m, wm2_ref[...], preferred_element_type=jnp.float32)
        m = _leaky_relu(m + bm2_ref[...])
        m = jnp.dot(m, wm3_ref[...], preferred_element_type=jnp.float32) + bm3_ref[...]
        o_ref[...] = m.astype(o_ref.dtype)


# --------------------------- parameter creation ---------------------------- #
def _init_linear_padded(key, fan_in, fan_out, fan_in_p, fan_out_p):
    # PyTorch nn.Linear default init: U(-1/sqrt(fan_in), 1/sqrt(fan_in)),
    # zero-padded once to MXU-friendly 128-lane shapes.
    kw, kb = jax.random.split(key)
    bound = 1.0 / float(fan_in) ** 0.5
    w = jax.random.uniform(kw, (fan_in, fan_out), jnp.float32, -bound, bound)
    b = jax.random.uniform(kb, (fan_out,), jnp.float32, -bound, bound)
    w_p = jnp.zeros((fan_in_p, fan_out_p), jnp.float32).at[:fan_in, :fan_out].set(w)
    b_p = jnp.zeros((1, fan_out_p), jnp.float32).at[0, :fan_out].set(b)
    return w_p, b_p


def _init_mlp3_padded(key, n_in, n_hid, n_out, n_in_p, n_hid_p, n_out_p):
    k1, k2, k3 = jax.random.split(key, 3)
    w1, b1 = _init_linear_padded(k1, n_in, n_hid, n_in_p, n_hid_p)
    w2, b2 = _init_linear_padded(k2, n_hid, n_hid, n_hid_p, n_hid_p)
    w3, b3 = _init_linear_padded(k3, n_hid, n_out, n_hid_p, n_out_p)
    return (w1, b1, w2, b2, w3, b3)


def init_radialgan_params(key, domains, n_features, n_units_latent, n_units_hidden):
    Lp = _round_up(max(n_units_latent, 1), 128)
    Hp = _round_up(max(n_units_hidden, 1), 128)
    Fp = _round_up(max(n_features, 1), 128)

    gen_layers = []   # per-domain tuples
    map_layers = []
    for _ in domains:
        key, kg, km = jax.random.split(key, 3)
        # generator: latent -> hidden -> hidden -> n_features
        gen_layers.append(
            _init_mlp3_padded(kg, n_units_latent, n_units_hidden, n_features, Lp, Hp, Fp)
        )
        # mapper: n_features -> hidden -> hidden -> n_features
        map_layers.append(
            _init_mlp3_padded(km, n_features, n_units_hidden, n_features, Fp, Hp, Fp)
        )

    # Stack per-domain params into [n_domains, ...] slabs for scalar-prefetch indexing.
    gen = tuple(jnp.stack([g[i] for g in gen_layers], axis=0) for i in range(6))
    mpr = tuple(jnp.stack([m[i] for m in map_layers], axis=0) for i in range(6))

    # TODO(synk): discriminators are only used in training losses, not in forward().
    return {
        "domain_index": {d: i for i, d in enumerate(domains)},
        "dims": {"F": n_features, "L": n_units_latent, "H": n_units_hidden,
                 "Fp": Fp, "Lp": Lp, "Hp": Hp},
        "gen": gen,
        "map": mpr,
    }


# ------------------------------ forward pass ------------------------------- #
def radialgan_forward(params, count, domains, domain_weights, key):
    """Mirrors RadialGAN.forward(count, domains) in eval mode (single fused kernel)."""
    d2i = params["domain_index"]
    dims = params["dims"]
    Lp, Fp = dims["Lp"], dims["Fp"]
    F = dims["F"]

    batch_per_domain = count // len(domains) + 1

    # Host-side enumeration of the (target, src) pairs (cheap Python ints).
    pair_gen, pair_map, pair_use, pair_batch, pair_target = [], [], [], [], []
    for target_domain in domains:
        for src_domain, w in domain_weights.items():
            src_batch = int(batch_per_domain * w)
            if src_batch == 0:
                continue  # original concatenates an empty tensor -> no-op
            pair_gen.append(d2i[src_domain])
            pair_map.append(d2i[target_domain])
            pair_use.append(int(src_domain != target_domain))
            pair_batch.append(src_batch)
            pair_target.append(target_domain)

    n_pairs = len(pair_gen)
    if n_pairs == 0:
        return jnp.zeros((0, F), jnp.float32), []

    Bp = max(8, _round_up(max(pair_batch), 8))

    # One batched noise draw for all pairs, already padded to (Bp, Lp);
    # extra columns/rows are killed by zero weight padding / sliced off below.
    noise = jax.random.normal(key, (n_pairs, Bp, Lp), dtype=jnp.float32)

    gen_idx = jnp.asarray(pair_gen, jnp.int32)
    map_idx = jnp.asarray(pair_map, jnp.int32)
    use_map = jnp.asarray(pair_use, jnp.int32)

    Hp = dims["Hp"]

    def _noise_map(i, g, m, u):
        return (i, 0, 0)

    def _gen_map(i, g, m, u):
        return (g[i], 0, 0)

    def _map_map(i, g, m, u):
        return (m[i], 0, 0)

    in_specs = [
        pl.BlockSpec((None, Bp, Lp), _noise_map),
        # generator slabs
        pl.BlockSpec((None, Lp, Hp), _gen_map),
        pl.BlockSpec((None, 1, Hp), _gen_map),
        pl.BlockSpec((None, Hp, Hp), _gen_map),
        pl.BlockSpec((None, 1, Hp), _gen_map),
        pl.BlockSpec((None, Hp, Fp), _gen_map),
        pl.BlockSpec((None, 1, Fp), _gen_map),
        # mapper slabs
        pl.BlockSpec((None, Fp, Hp), _map_map),
        pl.BlockSpec((None, 1, Hp), _map_map),
        pl.BlockSpec((None, Hp, Hp), _map_map),
        pl.BlockSpec((None, 1, Hp), _map_map),
        pl.BlockSpec((None, Hp, Fp), _map_map),
        pl.BlockSpec((None, 1, Fp), _map_map),
    ]

    out = pl.pallas_call(
        radialgan_pair_kernel,
        out_shape=jax.ShapeDtypeStruct((n_pairs, Bp, Fp), jnp.float32),
        grid_spec=pltpu.PrefetchScalarGridSpec(
            num_scalar_prefetch=3,
            grid=(n_pairs,),
            in_specs=in_specs,
            out_specs=pl.BlockSpec((None, Bp, Fp), lambda i, g, m, u: (i, 0, 0)),
        ),
        compiler_params=pltpu.CompilerParams(
            dimension_semantics=("parallel",),
        ),
    )(gen_idx, map_idx, use_map, noise, *params["gen"], *params["map"])

    # Slice off batch/feature padding per pair and concatenate (static slices).
    outs = []
    out_domains = []
    for p in range(n_pairs):
        outs.append(out[p, : pair_batch[p], :F])
        out_domains.extend([pair_target[p]] * pair_batch[p])
    return jnp.concatenate(outs, axis=0), out_domains


# ---------------------------------- main ----------------------------------- #
if __name__ == "__main__":
    key = jax.random.PRNGKey(0)

    domains = [0, 1]
    n_features = 16
    n_units_latent = 32
    n_units_hidden = 64          # generator_n_units_hidden (small for the demo)
    count = 8
    # domain_weights would normally come from fit(); use a deterministic uniform split.
    domain_weights = {0: 0.5, 1: 0.5}

    key, pkey, fkey = jax.random.split(key, 3)
    params = init_radialgan_params(
        pkey, domains, n_features, n_units_latent, n_units_hidden
    )

    samples, out_domains = radialgan_forward(
        params, count, domains, domain_weights, fkey
    )
    samples = jax.block_until_ready(samples)

    assert samples.shape == (len(out_domains), n_features), samples.shape
    assert samples.dtype == jnp.float32
    assert not bool(jnp.any(jnp.isnan(samples)))

    print("KERNEL_OK")
</pallas_src>

<mosaic_0001>
module attributes {stable_mosaic.version = 11 : i64} {
  func.func @radialgan_pair_kernel(%arg0: i32, %arg1: memref<4xi32, #tpu.memory_space<smem>>, %arg2: memref<4xi32, #tpu.memory_space<smem>>, %arg3: memref<4xi32, #tpu.memory_space<smem>>, %arg4: memref<1x8x128xf32, #tpu.memory_space<vmem>>, %arg5: memref<1x128x128xf32, #tpu.memory_space<vmem>>, %arg6: memref<1x1x128xf32, #tpu.memory_space<vmem>>, %arg7: memref<1x128x128xf32, #tpu.memory_space<vmem>>, %arg8: memref<1x1x128xf32, #tpu.memory_space<vmem>>, %arg9: memref<1x128x128xf32, #tpu.memory_space<vmem>>, %arg10: memref<1x1x128xf32, #tpu.memory_space<vmem>>, %arg11: memref<1x128x128xf32, #tpu.memory_space<vmem>>, %arg12: memref<1x1x128xf32, #tpu.memory_space<vmem>>, %arg13: memref<1x128x128xf32, #tpu.memory_space<vmem>>, %arg14: memref<1x1x128xf32, #tpu.memory_space<vmem>>, %arg15: memref<1x128x128xf32, #tpu.memory_space<vmem>>, %arg16: memref<1x1x128xf32, #tpu.memory_space<vmem>>, %arg17: memref<1x8x128xf32, #tpu.memory_space<vmem>>) attributes {dimension_semantics = [#tpu.dimension_semantics<parallel>], iteration_bounds = array<i64: 4>, scalar_prefetch = 3 : i64, scratch_operands = 0 : i64, tpu.core_type = #tpu.core_type<tc>, window_params = [{transform_indices = @transform_0, window_bounds = array<i64: 1, 8, 128>}, {transform_indices = @transform_1, window_bounds = array<i64: 1, 128, 128>}, {transform_indices = @transform_2, window_bounds = array<i64: 1, 1, 128>}, {transform_indices = @transform_3, window_bounds = array<i64: 1, 128, 128>}, {transform_indices = @transform_4, window_bounds = array<i64: 1, 1, 128>}, {transform_indices = @transform_5, window_bounds = array<i64: 1, 128, 128>}, {transform_indices = @transform_6, window_bounds = array<i64: 1, 1, 128>}, {transform_indices = @transform_7, window_bounds = array<i64: 1, 128, 128>}, {transform_indices = @transform_8, window_bounds = array<i64: 1, 1, 128>}, {transform_indices = @transform_9, window_bounds = array<i64: 1, 128, 128>}, {transform_indices = @transform_10, window_bounds = array<i64: 1, 1, 128>}, {transform_indices = @transform_11, window_bounds = array<i64: 1, 128, 128>}, {transform_indices = @transform_12, window_bounds = array<i64: 1, 1, 128>}, {transform_indices = @transform_13, window_bounds = array<i64: 1, 8, 128>}]} {
    %c0 = arith.constant 0 : index
    %c0_0 = arith.constant 0 : index
    %c0_1 = arith.constant 0 : index
    %0 = vector.load %arg4[%c0, %c0_0, %c0_1] : memref<1x8x128xf32, #tpu.memory_space<vmem>>, vector<1x8x128xf32>
    %1 = vector.shape_cast %0 : vector<1x8x128xf32> to vector<8x128xf32>
    %c0_2 = arith.constant 0 : index
    %c0_3 = arith.constant 0 : index
    %c0_4 = arith.constant 0 : index
    %2 = vector.load %arg5[%c0_2, %c0_3, %c0_4] : memref<1x128x128xf32, #tpu.memory_space<vmem>>, vector<1x128x128xf32>
    %3 = vector.shape_cast %2 : vector<1x128x128xf32> to vector<128x128xf32>
    %cst = arith.constant dense<0.000000e+00> : vector<8x128xf32>
    %4 = tpu.matmul %1, %3, %cst {dimension_numbers = #tpu.dot_dimension_numbers<[1], [0], [0], [1], [0, 0, 1, 1], [], []>} : vector<8x128xf32>, vector<128x128xf32>, vector<8x128xf32> -> vector<8x128xf32>
    %c0_5 = arith.constant 0 : index
    %c0_6 = arith.constant 0 : index
    %c0_7 = arith.constant 0 : index
    %5 = vector.load %arg6[%c0_5, %c0_6, %c0_7] : memref<1x1x128xf32, #tpu.memory_space<vmem>>, vector<1x1x128xf32>
    %6 = vector.shape_cast %5 : vector<1x1x128xf32> to vector<1x128xf32>
    %7 = vector.broadcast %6 : vector<1x128xf32> to vector<8x128xf32>
    %8 = arith.addf %4, %7 : vector<8x128xf32>
    %cst_8 = arith.constant 0.000000e+00 : f32
    %9 = vector.broadcast %cst_8 : f32 to vector<8x128xf32>
    %10 = arith.cmpf ogt, %8, %9 : vector<8x128xf32>
    %cst_9 = arith.constant 0.00999999977 : f32
    %11 = vector.broadcast %cst_9 : f32 to vector<8x128xf32>
    %12 = arith.mulf %11, %8 : vector<8x128xf32>
    %13 = arith.select %10, %8, %12 : vector<8x128xi1>, vector<8x128xf32>
    %c0_10 = arith.constant 0 : index
    %c0_11 = arith.constant 0 : index
    %c0_12 = arith.constant 0 : index
    %14 = vector.load %arg7[%c0_10, %c0_11, %c0_12] : memref<1x128x128xf32, #tpu.memory_space<vmem>>, vector<1x128x128xf32>
    %15 = vector.shape_cast %14 : vector<1x128x128xf32> to vector<128x128xf32>
    %cst_13 = arith.constant dense<0.000000e+00> : vector<8x128xf32>
    %16 = tpu.matmul %13, %15, %cst_13 {dimension_numbers = #tpu.dot_dimension_numbers<[1], [0], [0], [1], [0, 0, 1, 1], [], []>} : vector<8x128xf32>, vector<128x128xf32>, vector<8x128xf32> -> vector<8x128xf32>
    %c0_14 = arith.constant 0 : index
    %c0_15 = arith.constant 0 : index
    %c0_16 = arith.constant 0 : index
    %17 = vector.load %arg8[%c0_14, %c0_15, %c0_16] : memref<1x1x128xf32, #tpu.memory_space<vmem>>, vector<1x1x128xf32>
    %18 = vector.shape_cast %17 : vector<1x1x128xf32> to vector<1x128xf32>
    %19 = vector.broadcast %18 : vector<1x128xf32> to vector<8x128xf32>
    %20 = arith.addf %16, %19 : vector<8x128xf32>
    %cst_17 = arith.constant 0.000000e+00 : f32
    %21 = vector.broadcast %cst_17 : f32 to vector<8x128xf32>
    %22 = arith.cmpf ogt, %20, %21 : vector<8x128xf32>
    %cst_18 = arith.constant 0.00999999977 : f32
    %23 = vector.broadcast %cst_18 : f32 to vector<8x128xf32>
    %24 = arith.mulf %23, %20 : vector<8x128xf32>
    %25 = arith.select %22, %20, %24 : vector<8x128xi1>, vector<8x128xf32>
    %c0_19 = arith.constant 0 : index
    %c0_20 = arith.constant 0 : index
    %c0_21 = arith.constant 0 : index
    %26 = vector.load %arg9[%c0_19, %c0_20, %c0_21] : memref<1x128x128xf32, #tpu.memory_space<vmem>>, vector<1x128x128xf32>
    %27 = vector.shape_cast %26 : vector<1x128x128xf32> to vector<128x128xf32>
    %cst_22 = arith.constant dense<0.000000e+00> : vector<8x128xf32>
    %28 = tpu.matmul %25, %27, %cst_22 {dimension_numbers = #tpu.dot_dimension_numbers<[1], [0], [0], [1], [0, 0, 1, 1], [], []>} : vector<8x128xf32>, vector<128x128xf32>, vector<8x128xf32> -> vector<8x128xf32>
    %c0_23 = arith.constant 0 : index
    %c0_24 = arith.constant 0 : index
    %c0_25 = arith.constant 0 : index
    %29 = vector.load %arg10[%c0_23, %c0_24, %c0_25] : memref<1x1x128xf32, #tpu.memory_space<vmem>>, vector<1x1x128xf32>
    %30 = vector.shape_cast %29 : vector<1x1x128xf32> to vector<1x128xf32>
    %31 = vector.broadcast %30 : vector<1x128xf32> to vector<8x128xf32>
    %32 = arith.addf %28, %31 : vector<8x128xf32>
    %33 = arith.index_cast %arg0 : i32 to index
    %34 = memref.load %arg3[%33] : memref<4xi32, #tpu.memory_space<smem>>
    %c0_i32 = arith.constant 0 : i32
    %35 = arith.cmpi eq, %34, %c0_i32 : i32
    %36 = arith.extui %35 : i1 to i32
    %c0_i32_26 = arith.constant 0 : i32
    %37 = arith.cmpi ne, %36, %c0_i32_26 : i32
    scf.if %37 {
      %c0_29 = arith.constant 0 : index
      %c0_30 = arith.constant 0 : index
      %c0_31 = arith.constant 0 : index
      %41 = vector.load %arg17[%c0_29, %c0_30, %c0_31] : memref<1x8x128xf32, #tpu.memory_space<vmem>>, vector<1x8x128xf32>
      %42 = vector.shape_cast %41 : vector<1x8x128xf32> to vector<8x128xf32>
      %43 = vector.shape_cast %32 : vector<8x128xf32> to vector<1x8x128xf32>
      tpu.vector_store %arg17[%c0_29, %c0_30, %c0_31], %43 {strides = array<i32>} : memref<1x8x128xf32, #tpu.memory_space<vmem>>, vector<1x8x128xf32>,
    } else {
    }
    %c0_i32_27 = arith.constant 0 : i32
    %38 = arith.cmpi ne, %34, %c0_i32_27 : i32
    %39 = arith.extui %38 : i1 to i32
    %c0_i32_28 = arith.constant 0 : i32
    %40 = arith.cmpi ne, %39, %c0_i32_28 : i32
    scf.if %40 {
      %c0_29 = arith.constant 0 : index
      %c0_30 = arith.constant 0 : index
      %c0_31 = arith.constant 0 : index
      %41 = vector.load %arg11[%c0_29, %c0_30, %c0_31] : memref<1x128x128xf32, #tpu.memory_space<vmem>>, vector<1x128x128xf32>
      %42 = vector.shape_cast %41 : vector<1x128x128xf32> to vector<128x128xf32>
      %cst_32 = arith.constant dense<0.000000e+00> : vector<8x128xf32>
      %43 = tpu.matmul %32, %42, %cst_32 {dimension_numbers = #tpu.dot_dimension_numbers<[1], [0], [0], [1], [0, 0, 1, 1], [], []>} : vector<8x128xf32>, vector<128x128xf32>, vector<8x128xf32> -> vector<8x128xf32>
      %c0_33 = arith.constant 0 : index
      %c0_34 = arith.constant 0 : index
      %c0_35 = arith.constant 0 : index
      %44 = vector.load %arg12[%c0_33, %c0_34, %c0_35] : memref<1x1x128xf32, #tpu.memory_space<vmem>>, vector<1x1x128xf32>
      %45 = vector.shape_cast %44 : vector<1x1x128xf32> to vector<1x128xf32>
      %46 = vector.broadcast %45 : vector<1x128xf32> to vector<8x128xf32>
      %47 = arith.addf %43, %46 : vector<8x128xf32>
      %cst_36 = arith.constant 0.000000e+00 : f32
      %48 = vector.broadcast %cst_36 : f32 to vector<8x128xf32>
      %49 = arith.cmpf ogt, %47, %48 : vector<8x128xf32>
      %cst_37 = arith.constant 0.00999999977 : f32
      %50 = vector.broadcast %cst_37 : f32 to vector<8x128xf32>
      %51 = arith.mulf %50, %47 : vector<8x128xf32>
      %52 = arith.select %49, %47, %51 : vector<8x128xi1>, vector<8x128xf32>
      %c0_38 = arith.constant 0 : index
      %c0_39 = arith.constant 0 : index
      %c0_40 = arith.constant 0 : index
      %53 = vector.load %arg13[%c0_38, %c0_39, %c0_40] : memref<1x128x128xf32, #tpu.memory_space<vmem>>, vector<1x128x128xf32>
      %54 = vector.shape_cast %53 : vector<1x128x128xf32> to vector<128x128xf32>
      %cst_41 = arith.constant dense<0.000000e+00> : vector<8x128xf32>
      %55 = tpu.matmul %52, %54, %cst_41 {dimension_numbers = #tpu.dot_dimension_numbers<[1], [0], [0], [1], [0, 0, 1, 1], [], []>} : vector<8x128xf32>, vector<128x128xf32>, vector<8x128xf32> -> vector<8x128xf32>
      %c0_42 = arith.constant 0 : index
      %c0_43 = arith.constant 0 : index
      %c0_44 = arith.constant 0 : index
      %56 = vector.load %arg14[%c0_42, %c0_43, %c0_44] : memref<1x1x128xf32, #tpu.memory_space<vmem>>, vector<1x1x128xf32>
      %57 = vector.shape_cast %56 : vector<1x1x128xf32> to vector<1x128xf32>
      %58 = vector.broadcast %57 : vector<1x128xf32> to vector<8x128xf32>
      %59 = arith.addf %55, %58 : vector<8x128xf32>
      %cst_45 = arith.constant 0.000000e+00 : f32
      %60 = vector.broadcast %cst_45 : f32 to vector<8x128xf32>
      %61 = arith.cmpf ogt, %59, %60 : vector<8x128xf32>
      %cst_46 = arith.constant 0.00999999977 : f32
      %62 = vector.broadcast %cst_46 : f32 to vector<8x128xf32>
      %63 = arith.mulf %62, %59 : vector<8x128xf32>
      %64 = arith.select %61, %59, %63 : vector<8x128xi1>, vector<8x128xf32>
      %c0_47 = arith.constant 0 : index
      %c0_48 = arith.constant 0 : index
      %c0_49 = arith.constant 0 : index
      %65 = vector.load %arg15[%c0_47, %c0_48, %c0_49] : memref<1x128x128xf32, #tpu.memory_space<vmem>>, vector<1x128x128xf32>
      %66 = vector.shape_cast %65 : vector<1x128x128xf32> to vector<128x128xf32>
      %cst_50 = arith.constant dense<0.000000e+00> : vector<8x128xf32>
      %67 = tpu.matmul %64, %66, %cst_50 {dimension_numbers = #tpu.dot_dimension_numbers<[1], [0], [0], [1], [0, 0, 1, 1], [], []>} : vector<8x128xf32>, vector<128x128xf32>, vector<8x128xf32> -> vector<8x128xf32>
      %c0_51 = arith.constant 0 : index
      %c0_52 = arith.constant 0 : index
      %c0_53 = arith.constant 0 : index
      %68 = vector.load %arg16[%c0_51, %c0_52, %c0_53] : memref<1x1x128xf32, #tpu.memory_space<vmem>>, vector<1x1x128xf32>
      %69 = vector.shape_cast %68 : vector<1x1x128xf32> to vector<1x128xf32>
      %70 = vector.broadcast %69 : vector<1x128xf32> to vector<8x128xf32>
      %71 = arith.addf %67, %70 : vector<8x128xf32>
      %c0_54 = arith.constant 0 : index
      %c0_55 = arith.constant 0 : index
      %c0_56 = arith.constant 0 : index
      %72 = vector.load %arg17[%c0_54, %c0_55, %c0_56] : memref<1x8x128xf32, #tpu.memory_space<vmem>>, vector<1x8x128xf32>
      %73 = vector.shape_cast %72 : vector<1x8x128xf32> to vector<8x128xf32>
      %74 = vector.shape_cast %71 : vector<8x128xf32> to vector<1x8x128xf32>
      tpu.vector_store %arg17[%c0_54, %c0_55, %c0_56], %74 {strides = array<i32>} : memref<1x8x128xf32, #tpu.memory_space<vmem>>, vector<1x8x128xf32>,
    } else {
    }
    return
  }
  func.func @transform_0(%arg0: i32, %arg1: memref<4xi32, #tpu.memory_space<smem>>, %arg2: memref<4xi32, #tpu.memory_space<smem>>, %arg3: memref<4xi32, #tpu.memory_space<smem>>) -> (i32, i32, i32) {
    %c0_i32 = arith.constant 0 : i32
    %c0_i32_0 = arith.constant 0 : i32
    %c0_i32_1 = arith.constant 0 : i32
    return %arg0, %c0_i32, %c0_i32_0 : i32, i32, i32
  }
  func.func @transform_1(%arg0: i32, %arg1: memref<4xi32, #tpu.memory_space<smem>>, %arg2: memref<4xi32, #tpu.memory_space<smem>>, %arg3: memref<4xi32, #tpu.memory_space<smem>>) -> (i32, i32, i32) {
    %0 = arith.index_cast %arg0 : i32 to index
    %1 = memref.load %arg1[%0] : memref<4xi32, #tpu.memory_space<smem>>
    %c0_i32 = arith.constant 0 : i32
    %c0_i32_0 = arith.constant 0 : i32
    %c0_i32_1 = arith.constant 0 : i32
    return %1, %c0_i32, %c0_i32_0 : i32, i32, i32
  }
  func.func @transform_2(%arg0: i32, %arg1: memref<4xi32, #tpu.memory_space<smem>>, %arg2: memref<4xi32, #tpu.memory_space<smem>>, %arg3: memref<4xi32, #tpu.memory_space<smem>>) -> (i32, i32, i32) {
    %0 = arith.index_cast %arg0 : i32 to index
    %1 = memref.load %arg1[%0] : memref<4xi32, #tpu.memory_space<smem>>
    %c0_i32 = arith.constant 0 : i32
    %c0_i32_0 = arith.constant 0 : i32
    %c0_i32_1 = arith.constant 0 : i32
    return %1, %c0_i32, %c0_i32_0 : i32, i32, i32
  }
  func.func @transform_3(%arg0: i32, %arg1: memref<4xi32, #tpu.memory_space<smem>>, %arg2: memref<4xi32, #tpu.memory_space<smem>>, %arg3: memref<4xi32, #tpu.memory_space<smem>>) -> (i32, i32, i32) {
    %0 = arith.index_cast %arg0 : i32 to index
    %1 = memref.load %arg1[%0] : memref<4xi32, #tpu.memory_space<smem>>
    %c0_i32 = arith.constant 0 : i32
    %c0_i32_0 = arith.constant 0 : i32
    %c0_i32_1 = arith.constant 0 : i32
    return %1, %c0_i32, %c0_i32_0 : i32, i32, i32
  }
  func.func @transform_4(%arg0: i32, %arg1: memref<4xi32, #tpu.memory_space<smem>>, %arg2: memref<4xi32, #tpu.memory_space<smem>>, %arg3: memref<4xi32, #tpu.memory_space<smem>>) -> (i32, i32, i32) {
    %0 = arith.index_cast %arg0 : i32 to index
    %1 = memref.load %arg1[%0] : memref<4xi32, #tpu.memory_space<smem>>
    %c0_i32 = arith.constant 0 : i32
    %c0_i32_0 = arith.constant 0 : i32
    %c0_i32_1 = arith.constant 0 : i32
    return %1, %c0_i32, %c0_i32_0 : i32, i32, i32
  }
  func.func @transform_5(%arg0: i32, %arg1: memref<4xi32, #tpu.memory_space<smem>>, %arg2: memref<4xi32, #tpu.memory_space<smem>>, %arg3: memref<4xi32, #tpu.memory_space<smem>>) -> (i32, i32, i32) {
    %0 = arith.index_cast %arg0 : i32 to index
    %1 = memref.load %arg1[%0] : memref<4xi32, #tpu.memory_space<smem>>
    %c0_i32 = arith.constant 0 : i32
    %c0_i32_0 = arith.constant 0 : i32
    %c0_i32_1 = arith.constant 0 : i32
    return %1, %c0_i32, %c0_i32_0 : i32, i32, i32
  }
  func.func @transform_6(%arg0: i32, %arg1: memref<4xi32, #tpu.memory_space<smem>>, %arg2: memref<4xi32, #tpu.memory_space<smem>>, %arg3: memref<4xi32, #tpu.memory_space<smem>>) -> (i32, i32, i32) {
    %0 = arith.index_cast %arg0 : i32 to index
    %1 = memref.load %arg1[%0] : memref<4xi32, #tpu.memory_space<smem>>
    %c0_i32 = arith.constant 0 : i32
    %c0_i32_0 = arith.constant 0 : i32
    %c0_i32_1 = arith.constant 0 : i32
    return %1, %c0_i32, %c0_i32_0 : i32, i32, i32
  }
  func.func @transform_7(%arg0: i32, %arg1: memref<4xi32, #tpu.memory_space<smem>>, %arg2: memref<4xi32, #tpu.memory_space<smem>>, %arg3: memref<4xi32, #tpu.memory_space<smem>>) -> (i32, i32, i32) {
    %0 = arith.index_cast %arg0 : i32 to index
    %1 = memref.load %arg2[%0] : memref<4xi32, #tpu.memory_space<smem>>
    %c0_i32 = arith.constant 0 : i32
    %c0_i32_0 = arith.constant 0 : i32
    %c0_i32_1 = arith.constant 0 : i32
    return %1, %c0_i32, %c0_i32_0 : i32, i32, i32
  }
  func.func @transform_8(%arg0: i32, %arg1: memref<4xi32, #tpu.memory_space<smem>>, %arg2: memref<4xi32, #tpu.memory_space<smem>>, %arg3: memref<4xi32, #tpu.memory_space<smem>>) -> (i32, i32, i32) {
    %0 = arith.index_cast %arg0 : i32 to index
    %1 = memref.load %arg2[%0] : memref<4xi32, #tpu.memory_space<smem>>
    %c0_i32 = arith.constant 0 : i32
    %c0_i32_0 = arith.constant 0 : i32
    %c0_i32_1 = arith.constant 0 : i32
    return %1, %c0_i32, %c0_i32_0 : i32, i32, i32
  }
  func.func @transform_9(%arg0: i32, %arg1: memref<4xi32, #tpu.memory_space<smem>>, %arg2: memref<4xi32, #tpu.memory_space<smem>>, %arg3: memref<4xi32, #tpu.memory_space<smem>>) -> (i32, i32, i32) {
    %0 = arith.index_cast %arg0 : i32 to index
    %1 = memref.load %arg2[%0] : memref<4xi32, #tpu.memory_space<smem>>
    %c0_i32 = arith.constant 0 : i32
    %c0_i32_0 = arith.constant 0 : i32
    %c0_i32_1 = arith.constant 0 : i32
    return %1, %c0_i32, %c0_i32_0 : i32, i32, i32
  }
  func.func @transform_10(%arg0: i32, %arg1: memref<4xi32, #tpu.memory_space<smem>>, %arg2: memref<4xi32, #tpu.memory_space<smem>>, %arg3: memref<4xi32, #tpu.memory_space<smem>>) -> (i32, i32, i32) {
    %0 = arith.index_cast %arg0 : i32 to index
    %1 = memref.load %arg2[%0] : memref<4xi32, #tpu.memory_space<smem>>
    %c0_i32 = arith.constant 0 : i32
    %c0_i32_0 = arith.constant 0 : i32
    %c0_i32_1 = arith.constant 0 : i32
    return %1, %c0_i32, %c0_i32_0 : i32, i32, i32
  }
  func.func @transform_11(%arg0: i32, %arg1: memref<4xi32, #tpu.memory_space<smem>>, %arg2: memref<4xi32, #tpu.memory_space<smem>>, %arg3: memref<4xi32, #tpu.memory_space<smem>>) -> (i32, i32, i32) {
    %0 = arith.index_cast %arg0 : i32 to index
    %1 = memref.load %arg2[%0] : memref<4xi32, #tpu.memory_space<smem>>
    %c0_i32 = arith.constant 0 : i32
    %c0_i32_0 = arith.constant 0 : i32
    %c0_i32_1 = arith.constant 0 : i32
    return %1, %c0_i32, %c0_i32_0 : i32, i32, i32
  }
  func.func @transform_12(%arg0: i32, %arg1: memref<4xi32, #tpu.memory_space<smem>>, %arg2: memref<4xi32, #tpu.memory_space<smem>>, %arg3: memref<4xi32, #tpu.memory_space<smem>>) -> (i32, i32, i32) {
    %0 = arith.index_cast %arg0 : i32 to index
    %1 = memref.load %arg2[%0] : memref<4xi32, #tpu.memory_space<smem>>
    %c0_i32 = arith.constant 0 : i32
    %c0_i32_0 = arith.constant 0 : i32
    %c0_i32_1 = arith.constant 0 : i32
    return %1, %c0_i32, %c0_i32_0 : i32, i32, i32
  }
  func.func @transform_13(%arg0: i32, %arg1: memref<4xi32, #tpu.memory_space<smem>>, %arg2: memref<4xi32, #tpu.memory_space<smem>>, %arg3: memref<4xi32, #tpu.memory_space<smem>>) -> (i32, i32, i32) {
    %c0_i32 = arith.constant 0 : i32
    %c0_i32_0 = arith.constant 0 : i32
    %c0_i32_1 = arith.constant 0 : i32
    return %arg0, %c0_i32, %c0_i32_0 : i32, i32, i32
  }
}

</mosaic_0001>

<bundles_post_ra>
// kernel: tpu_custom_call.1
= control target key start
LH: loop header
LB: loop body
LE: loop exit
PB: predicated region body
PF: predicated region fallthrough
CT: control target
= control target key end

     0   :  { %s2188_s27 = smov [#allocation3]   ;;  %s2189_s28 = smov [#allocation4]   ;;  %s3208_s0 = inlined_call_operand.hbm [shape: s32[4], index: 0, kind: input, shape index: {}]   ;;  %s3209_s3 = inlined_call_operand.hbm [shape: f32[4,8,128], index: 3, kind: input, shape index: {}]   ;;  %s3210_s4 = inlined_call_operand.hbm [shape: f32[2,128,128], index: 4, kind: input, shape index: {}]   ;;  %s3211_s5 = inlined_call_operand.vmem [shape: f32[2,1,128], index: 5, kind: input, shape index: {}]   ;;  %s3212_s6 = inlined_call_operand.hbm [shape: f32[2,128,128], index: 6, kind: input, shape index: {}]   ;;  %s3213_s7 = inlined_call_operand.vmem [shape: f32[2,1,128], index: 7, kind: input, shape index: {}]   ;;  %s3214_s8 = inlined_call_operand.hbm [shape: f32[2,128,128], index: 8, kind: input, shape index: {}]   ;;  %s3215_s9 = inlined_call_operand.vmem [shape: f32[2,1,128], index: 9, kind: input, shape index: {}]   ;;  %s3216_s10 = inlined_call_operand.hbm [shape: f32[2,128,128], index: 10, kind: input, shape index: {}]   ;;  %s3217_s11 = inlined_call_operand.vmem [shape: f32[2,1,128], index: 11, kind: input, shape index: {}]   ;;  %s3218_s12 = inlined_call_operand.hbm [shape: f32[2,128,128], index: 12, kind: input, shape index: {}]   ;;  %s3219_s13 = inlined_call_operand.vmem [shape: f32[2,1,128], index: 13, kind: input, shape index: {}]   ;;  %s3220_s14 = inlined_call_operand.hbm [shape: f32[2,128,128], index: 14, kind: input, shape index: {}]   ;;  %s3221_s15 = inlined_call_operand.vmem [shape: f32[2,1,128], index: 15, kind: input, shape index: {}]   ;;  %s3222_s16 = inlined_call_operand.hbm [shape: f32[4,8,128], index: 16, kind: output, shape index: {}]   ;;  %s3223_s1 = inlined_call_operand.hbm [shape: s32[4], index: 1, kind: input, shape index: {}]   ;;  %s3224_s2 = inlined_call_operand.hbm [shape: s32[4], index: 2, kind: input, shape index: {}]  }
   0x1   :  { %3279 = sst [smem:[#allocation66_spill]] %s3208_s0  ;;  %s27_s26 = sshll.u32 %s3223_s1, 4  ;;  %s28_s26 = int_to_ptr.hbm [resolvable:$true] %s27_s26 }
   0x2   :  { %3280 = sst [smem:[#allocation67_spill]] %s3209_s3  ;;  %s32_s0 = sshll.u32 %s3224_s2, 4  ;;  %s33_s0 = int_to_ptr.hbm [resolvable:$true] %s32_s0 }
   0x3   :  { %3281 = sst [smem:[#allocation68_spill]] %s3210_s4  ;;  %s2190_s17 = smov [#allocation5]  }
   0x4   :  { %3282 = sst [smem:[#allocation69_spill]] %s3211_s5 }
   0x5   :  { %3283 = sst [smem:[#allocation70_spill]] %s3212_s6 }
   0x6   :  { %3284 = sst [smem:[#allocation71_spill]] %s3213_s7 }
   0x7   :  { %3285 = sst [smem:[#allocation72_spill]] %s3214_s8 }
   0x8   :  { %3286 = sst [smem:[#allocation73_spill]] %s3215_s9 }
   0x9   :  { %3287 = sst [smem:[#allocation74_spill]] %s3216_s10 }
   0xa   :  { %3288 = sst [smem:[#allocation75_spill]] %s3217_s11 }
   0xb   :  { %3289 = sst [smem:[#allocation76_spill]] %s3218_s12 }
   0xc   :  { %3290 = sst [smem:[#allocation77_spill]] %s3219_s13 }
   0xd   :  { %3291 = sst [smem:[#allocation78_spill]] %s3220_s14 }
   0xe   :  { %3292 = sst [smem:[#allocation79_spill]] %s3221_s15 }
   0xf   :  { %3293 = sst [smem:[#allocation80_spill]] %s3222_s16 }
  0x10   :  { %s3294_s23 = sld [smem:[#allocation66_spill]] }
  0x16   :  { %s22_s9 = sshll.u32 %s3294_s23, 4  ;;  %s23_s9 = int_to_ptr.hbm [resolvable:$true] %s22_s9 }
  0x17   :  { %25 = dma.hbm_to_smem %s23_s9, 16, %s2188_s27, [#allocation2] }
  0x18   :  { %30 = dma.hbm_to_smem %s28_s26, 16, %s2189_s28, [#allocation2] }
  0x19   :  { %35 = dma.hbm_to_smem %s33_s0, 16, %s2190_s17, [#allocation2] }
  0x1a   :  { %2066 = dma.done.wait [#allocation2], 48 }
  0x1b   :  { %2067 = vsyncadd [#allocation2], 4294967248 }
  0x1c   :  { %38 = sfence }
  0x1d   :  { %39 = vsyncpa [#allocation7], 0 }
  0x1e   :  { %41 = vsyncpa [#allocation7 + $0x1], 0 }
  0x1f   :  { %42 = vsyncpa [#allocation10], 0 }
  0x20   :  { %44 = vsyncpa [#allocation10 + $0x1], 0 }
  0x21   :  { %45 = vsyncpa [#allocation13], 0 }
  0x22   :  { %47 = vsyncpa [#allocation13 + $0x1], 0 }
  0x23   :  { %48 = vsyncpa [#allocation16], 0 }
  0x24   :  { %50 = vsyncpa [#allocation16 + $0x1], 0 }
  0x25   :  { %51 = vsyncpa [#allocation8], 0 }
  0x26   :  { %53 = vsyncpa [#allocation8 + $0x1], 0  ;;  %s2287_s1 = smov 0   ;;  %s2289_s9 = smov 0  }
  0x27   :  { %s2291_s2 = smov 0   ;;  %s2293_s18 = smov 0  }
  0x28   :  { %s2295_s19 = smov 0   ;;  %s2297_s20 = smov 0  }
  0x29   :  { %s2299_s21 = smov 0   ;;  %s2301_s22 = smov 0  }
  0x2a   :  { %s2303_s23 = smov 0   ;;  %s2305_s24 = smov 0  }
  0x2b   :  { %s2307_s25 = smov 0   ;;  %s2309_s26 = smov 0  }
  0x2c   :  { %s2311_s27 = smov 0   ;;  %s2313_s28 = smov 0  }
  0x2d   :  { %s2315_s29 = smov 0   ;;  %s2317_s30 = smov 0  }
  0x2e   :  { %s2319_s0 = smov 0   ;;  %s2321_s17 = smov 0  }
  0x2f   :  { %s2323_s16 = smov 0   ;;  %s2325_s7 = smov 0  }
  0x30   :  { %s2327_s5 = smov 0   ;;  %s2329_s15 = smov 0  }
  0x31 LB: > { %3295 = sst [smem:[#allocation40_spill]] %s2102_s1  ;;  %s2398_s13 = sadd.s32 1, %s2186_s15   ;;  %s2186_s15 = sphi %s2329_s15, %s3440_s15   ;;  %s2182_s5 = sphi %s2327_s5, %s3468_s5   ;;  %s2178_s7 = sphi %s2325_s7, %s3467_s7   ;;  %s2174_s16 = sphi %s2323_s16, %s3466_s16   ;;  %s2170_s17 = sphi %s2321_s17, %s3455_s17   ;;  %s2166_s0 = sphi %s2319_s0, %s3465_s0   ;;  %s2162_s30 = sphi %s2317_s30, %s3464_s30   ;;  %s2158_s29 = sphi %s2315_s29, %s3463_s29   ;;  %s2154_s28 = sphi %s2313_s28, %s3452_s28   ;;  %s2150_s27 = sphi %s2311_s27, %s3451_s27   ;;  %s2146_s26 = sphi %s2309_s26, %s3450_s26   ;;  %s2142_s25 = sphi %s2307_s25, %s3462_s25   ;;  %s2138_s24 = sphi %s2305_s24, %s3461_s24   ;;  %s2134_s23 = sphi %s2303_s23, %s3448_s23   ;;  %s2130_s22 = sphi %s2301_s22, %s3447_s22   ;;  %s2126_s21 = sphi %s2299_s21, %s3446_s21   ;;  %s2122_s20 = sphi %s2297_s20, %s3459_s20   ;;  %s2118_s19 = sphi %s2295_s19, %s3444_s19   ;;  %s2114_s18 = sphi %s2293_s18, %s3443_s18   ;;  %s2110_s2 = sphi %s2291_s2, %s3456_s2   ;;  %s2106_s9 = sphi %s2289_s9, %s3442_s9   ;;  %s2102_s1 = sphi %s2287_s1, %s3441_s1  }
  0x32   : > { %3296 = sst [smem:[#allocation41_spill]] %s2106_s9  ;;  %p3252_p0 = scmp.eq.s32.totalorder %s2186_s15, 0 }
  0x33   : > { %3297 = sst [smem:[#allocation42_spill]] %s2110_s2  ;;  %s94_s14 = sadd.s32 1, %s2170_s17 }
  0x34   : > { %3298 = sst [smem:[#allocation43_spill]] %s2114_s18  ;;  %p101_p1 = scmp.ne.s32.totalorder %s2170_s17, %s2166_s0 }
  0x35   : > { %3299 = sst [smem:[#allocation44_spill]] %s2118_s19  ;;  %p3251_p4 = scmp.lt.s32.totalorder %s2186_s15, 4 }
  0x36   : > { %3300 = sst [smem:[#allocation45_spill]] %s2122_s20  ;;  %p2410_p3 = por %p101_p1, %p3252_p0 }
  0x37   : > { %3301 = sst [smem:[#allocation46_spill]] %s2126_s21  ;;  %s2416_s2 = sand.u32 1, %s2186_s15  }
  0x38   : > { %3302 = sst [smem:[#allocation47_spill]] %s2130_s22  ;;  %s486_s9 = sand.u32 1, %s2170_s17  }
  0x39   : > { %3303 = sst [smem:[#allocation48_spill]] %s2134_s23  ;;  %s1410_s6 = sshll.u32 %s486_s9, 7 }
  0x3a   : > { %3304 = sst [smem:[#allocation49_spill]] %s2146_s26  ;;  %p2423_p5 = pnand %p3251_p4, %p2410_p3 }
  0x3b   : > { %3305 = sst [smem:[#allocation50_spill]] %s2150_s27  ;;  %s488_s22 = scalar_lea.vmem [#allocation9], %s1410_s6 }
  0x3c   : > { %3306 = sst [smem:[#allocation51_spill]] %s2154_s28  ;;  %s2427_s27 = sshll.u32 %s488_s22, 4 }
  0x3d   : > { %3307 = sst [smem:[#allocation52_spill]] %s2158_s29  ;;  %p1428_p7 = scmp.ge.s32.totalorder %s2186_s15, 1 }
  0x3e   : > { %3308 = sst [smem:[#allocation53_spill]] %s2162_s30  ;;  %p668_p8 = scmp.lt.s32.totalorder %s2186_s15, 5 }
  0x3f   : > { %3309 = sst [smem:[#allocation54_spill]] %s2170_s17  ;;  %p213_p10 = scmp.ne.s32.totalorder %s2146_s26, %s2142_s25 }
  0x40   : > { %3310 = sst [smem:[#allocation55_spill]] %s2174_s16  ;;  %p2444_p9 = pnand %p1428_p7, %p668_p8 }
  0x41   : > { %3311 = sst [smem:[#allocation56_spill]] %s2182_s5  ;;  %p1744_p13 = pneg %p2423_p5 }
  0x42   : > { %3312 = sst [smem:[#allocation57_spill]] %s2398_s13 }
  0x43   : > { %s89_s11 = sld [smem:[#allocation3 + %s2186_s15]] }
  0x44   : > { %s90_s10 = sld [smem:[#allocation3 + %s2398_s13]] }
  0x45   : > { %3315 = sst [smem:[#allocation58_spill]] %s2427_s27 }
  0x46   : > { %s1450_s9 = scalar_select %p2410_p3, [#allocation3], [#allocation19] }
  0x47   : > { %s1451_s28 = scalar_select %p2410_p3, %s2186_s15, 0 }
  0x48   : > { %s3470_s9 = smov (!%p3251_p4, %s1450_s9), [#allocation25]  ;;  %s202_s1 = sld [smem:[#allocation3 + %s2398_s13]] }
  0x49   : > { %s3472_s28 = smov (!%p3251_p4, %s1451_s28), 0  ;;  %s3319_s4 = sld [smem:[#allocation68_spill]] }
  0x4a   : > { %s91_s23 = ssub.s32 %s89_s11, %s90_s10  ;;  %s489_s6 = sld [smem:[%s3470_s9 + %s3472_s28]] }
  0x4b   : > { %p92_p6 = scmp.eq.s32.totalorder %s91_s23, 0  ;;  %s2449_s11 = sld [smem:[#allocation3 + %s2186_s15]] }
  0x4c   : > { %s3317_s10 = scalar_select %p2444_p9, 1, 0 }
  0x4d   : > { %s2433_s29 = scalar_select %p92_p6, %s2170_s17, %s94_s14  }
  0x4e   : > { %3318 = sst [smem:[#allocation60_spill]] %s3317_s10  ;;  %s3242_s28 = scalar_lea.sflag [#allocation10], %s2416_s2 }
  0x4f   : > { %3316 = sst [smem:[#allocation59_spill]] %s2433_s29  ;;  %s206_s29 = sadd.s32 1, %s2146_s26 }
  0x50   : > { %s1443_s14 = sshll.u32 %s489_s6, 7  ;;  %s1747_s30 = scalar_lea.hbm %s3319_s4, 256 }
  0x51   : > { %s494_s27 = scalar_lea.hbm %s3319_s4, %s1443_s14 }
  0x52   : > { %s495_s17 = sshll.u32 %s494_s27, 4  ;;  %s496_s17 = int_to_ptr.hbm [resolvable:$true] %s495_s17 }
  0x53   : > { %s1740_s9 = sshra.s32 %s496_s17, 4  ;;  %s1741_s9 = int_to_ptr.hbm [resolvable:$true] %s1740_s9 }
  0x54   : > { %s1742_s3 = scalar_lea.hbm %s1741_s9, 128  ;;  %p1748_p6 = scmp.lt.s32.totalorder %s1741_s9, %s3319_s4 }
  0x55   : > { %p1743_p12 = scmp.ne.s32.totalorder %s1741_s9, %s1742_s3  ;;  %p1749_p7 = scmp.lt.s32.totalorder %s1747_s30, %s1742_s3 }
  0x57   : > { %p1745_p1 = pnand %p1744_p13, %p1743_p12  ;;  %p1750_p8 = por %p1749_p7, %p1748_p6 }
  0x59   : > { %p1746_p3 = pneg %p1745_p1 }
  0x5b   : > { %p1751_p11 = pnand %p1750_p8, %p1746_p3 }
  0x5d   : > { %1754 = shalt.err (!%p1751_p11)
}
  0x5e   : > { %s3243_s27 = smov 128   ;;  %s3320_s23 = sld [smem:[#allocation58_spill]] }
  0x5f   : > { %s3245_s10 = smov 8   ;;  %p215_p11 = por %p213_p10, %p3252_p0 }
  0x60   : > { %s203_s30 = ssub.s32 %s2449_s11, %s202_s1  ;;  %s548_s9 = sand.u32 1, %s2146_s26  }
  0x61   : > { %p204_p12 = scmp.eq.s32.totalorder %s203_s30, 0  ;;  %s1416_s6 = sshll.u32 %s548_s9, 7 }
  0x62   : > { %p2487_p13 = pnand %p3251_p4, %p215_p11  ;;  %s550_s11 = scalar_lea.vmem [#allocation12], %s1416_s6 }
  0x63   : > { %s1456_s22 = scalar_select %p215_p11, [#allocation3], [#allocation21] }
  0x64   : > { %s3321_s3 = int_to_ptr.vmem [resolvable:$true] %s3320_s23  ;;  %s2499_s1 = sshll.u32 %s550_s11, 4 }
  0x65   : > { %1485 = dma.hbm_to_vmem [thread:$0]  (!%p2423_p5), %s496_s17, 2048, %s3321_s3, %s3242_s28, %s3243_s27, %s3243_s27, %s3245_s10  }
  0x66   : > { %s2492_s17 = scalar_select %p204_p12, %s2146_s26, %s206_s29  }
  0x67   : > { %s1457_s14 = scalar_select %p215_p11, %s2186_s15, 0 }
  0x68   : > { %3323 = sst [smem:[#allocation61_spill]] %s2492_s17  ;;  %s3474_s22 = smov (!%p3251_p4, %s1456_s22), [#allocation27] }
  0x69   : > { %s3476_s14 = smov (!%p3251_p4, %s1457_s14), 0  ;;  %3324 = sst [smem:[#allocation58_spill]] %s2499_s1 }
  0x6a   : > { %s551_s23 = sld [smem:[%s3474_s22 + %s3476_s14]]  ;;  %p325_p5 = scmp.ne.s32.totalorder %s2122_s20, %s2118_s19 }
  0x6b   : > { %s2503_s3 = sld [smem:[#allocation4 + %s2186_s15]]  ;;  %s610_s22 = sand.u32 1, %s2122_s20  }
  0x6c   : > { %s314_s30 = sld [smem:[#allocation4 + %s2398_s13]]  ;;  %p2516_p1 = por %p325_p5, %p3252_p0 }
  0x6d   : > { %s3325_s8 = sld [smem:[#allocation72_spill]]  ;;  %p1774_p6 = pneg %p2487_p13 }
  0x70   : > { %s1445_s9 = sshll.u32 %s551_s23, 7 }
  0x73   : > { %s556_s10 = scalar_lea.hbm %s3325_s8, %s1445_s9  ;;  %s1777_s27 = scalar_lea.hbm %s3325_s8, 256 }
  0x74   : > { %s557_s11 = sshll.u32 %s556_s10, 4  ;;  %s558_s11 = int_to_ptr.hbm [resolvable:$true] %s557_s11 }
  0x75   : > { %s1770_s1 = sshra.s32 %s558_s11, 4  ;;  %s1771_s1 = int_to_ptr.hbm [resolvable:$true] %s1770_s1 }
  0x76   : > { %s1772_s29 = scalar_lea.hbm %s1771_s1, 128  ;;  %p1778_p11 = scmp.lt.s32.totalorder %s1771_s1, %s3325_s8 }
  0x77   : > { %p1773_p3 = scmp.ne.s32.totalorder %s1771_s1, %s1772_s29  ;;  %p1779_p12 = scmp.lt.s32.totalorder %s1777_s27, %s1772_s29 }
  0x79   : > { %p1775_p7 = pnand %p1774_p6, %p1773_p3  ;;  %p1780_p5 = por %p1779_p12, %p1778_p11 }
  0x7b   : > { %p1776_p8 = pneg %p1775_p7 }
  0x7d   : > { %p1781_p10 = pnand %p1780_p5, %p1776_p8 }
  0x7f   : > { %1784 = shalt.err (!%p1781_p10)
}
  0x80   : > { %s3327_s10 = smov 8   ;;  %s3328_s14 = smov 128  }
  0x81   : > { %s3329_s17 = scalar_lea.sflag [#allocation13], %s2416_s2  ;;  %s3330_s26 = sld [smem:[#allocation58_spill]] }
  0x82   : > { %s315_s4 = ssub.s32 %s2503_s3, %s314_s30  ;;  %s1422_s21 = sshll.u32 %s610_s22, 7 }
  0x83   : > { %p316_p10 = scmp.eq.s32.totalorder %s315_s4, 0  ;;  %s3332_s1 = sadd.s32 1, %s2122_s20 }
  0x84   : > { %s1463_s23 = scalar_select %p2516_p1, %s2186_s15, 0 }
  0x85   : > { %s2545_s29 = scalar_select %p316_p10, %s2122_s20, %s3332_s1  }
  0x86   : > { %s3480_s23 = smov (!%p3251_p4, %s1463_s23), 0  ;;  %s63_s28 = ssub.s32 %s2186_s15, %s2398_s13 }
  0x87   : > { %s3331_s18 = int_to_ptr.vmem [resolvable:$true] %s3330_s26  ;;  %3333 = sst [smem:[#allocation62_spill]] %s2545_s29 }
  0x88   : > { %1495 = dma.hbm_to_vmem [thread:$0]  (!%p2487_p13), %s558_s11, 2048, %s3331_s18, %s3329_s17, %s3328_s14, %s3328_s14, %s3327_s10  }
  0x89   : > { %s1462_s26 = scalar_select %p2516_p1, [#allocation4], [#allocation23] }
  0x8a   : > { %s612_s18 = scalar_lea.vmem [#allocation15], %s1422_s21  ;;  %p2560_p13 = pnand %p3251_p4, %p2516_p1 }
  0x8b   : > { %s3478_s26 = smov (!%p3251_p4, %s1462_s26), [#allocation29]  ;;  %s2554_s17 = sshll.u32 %s612_s18, 4 }
  0x8c   : > { %3334 = sst [smem:[#allocation58_spill]] %s2554_s17  ;;  %s2566_s11 = sadd.s32 4294967295, %s2186_s15  }
  0x8d   : > { %s613_s30 = sld [smem:[%s3478_s26 + %s3480_s23]]  ;;  %p2571_p3 = scmp.eq.s32.totalorder %s63_s28, 0 }
  0x8e   : > { %s3337_s12 = sld [smem:[#allocation76_spill]]  ;;  %s66_s1 = sadd.s32 1, %s2182_s5 }
  0x8f   : > { %p73_p1 = scmp.ne.s32.totalorder %s2182_s5, %s2178_s7  ;;  %p3253_p6 = scmp.ne.s32.totalorder %s2178_s7, %s2174_s16 }
  0x90   : > { %s3255_s26 = scalar_lea.sflag [#allocation16], %s2416_s2  ;;  %p1804_p8 = pneg %p2560_p13 }
  0x93   : > { %s1447_s27 = sshll.u32 %s613_s30, 7 }
  0x94   : > { %s618_s21 = scalar_lea.hbm %s3337_s12, %s1447_s27  ;;  %s1807_s22 = scalar_lea.hbm %s3337_s12, 256 }
  0x95   : > { %s619_s18 = sshll.u32 %s618_s21, 4  ;;  %s620_s18 = int_to_ptr.hbm [resolvable:$true] %s619_s18 }
  0x96   : > { %s1800_s23 = sshra.s32 %s620_s18, 4  ;;  %s1801_s23 = int_to_ptr.hbm [resolvable:$true] %s1800_s23 }
  0x97   : > { %s1802_s17 = scalar_lea.hbm %s1801_s23, 128  ;;  %p1808_p5 = scmp.lt.s32.totalorder %s1801_s23, %s3337_s12 }
  0x98   : > { %p1803_p7 = scmp.ne.s32.totalorder %s1801_s23, %s1802_s17  ;;  %p1809_p10 = scmp.lt.s32.totalorder %s1807_s22, %s1802_s17 }
  0x9a   : > { %p1805_p11 = pnand %p1804_p8, %p1803_p7  ;;  %p1810_p4 = por %p1809_p10, %p1808_p5 }
  0x9c   : > { %p1806_p12 = pneg %p1805_p11 }
  0x9e   : > { %p1811_p2 = pnand %p1810_p4, %p1806_p12 }
  0xa0   : > { %1814 = shalt.err (!%p1811_p2)
}
  0xa1   : > { %s3338_s6 = sld [smem:[#allocation58_spill]]  ;;  %p2611_p2 = por %p3252_p0, %p73_p1 }
  0xa2   : > { %s3340_s17 = sld [smem:[#allocation53_spill]]  ;;  %p3259_p4 = scmp.eq.s32.totalorder %s2566_s11, 0 }
  0xa3   : > { %s3341_s3 = sld [smem:[#allocation43_spill]]  ;;  %p439_p7 = scmp.eq.s32.totalorder %s2566_s11, 3 }
  0xa4   : > { %s2604_s22 = scalar_select %p2571_p3, %s2182_s5, %s66_s1  }
  0xa5   : > { %s3344_s30 = sadd.s32 4294967294, %s2186_s15   ;;  %p3348_p12 = scmp.ne.s32.totalorder %s2142_s25, %s2138_s24 }
  0xa6   : > { %3342 = sst [smem:[#allocation63_spill]] %s2604_s22  ;;  %p445_p8 = scmp.eq.s32.totalorder %s3344_s30, 3 }
  0xa7   : > { %s3339_s21 = int_to_ptr.vmem [resolvable:$true] %s3338_s6  ;;  %p2642_p5 = por %p3348_p12, %p3259_p4 }
  0xa8   : > { %1505 = dma.hbm_to_vmem [thread:$0]  (!%p2560_p13), %s620_s18, 2048, %s3339_s21, %s3255_s26, %s3328_s14, %s3328_s14, %s3327_s10  }
  0xa9   : > { %p2624_p13 = por %p3259_p4, %p3253_p6  ;;  %p3346_p3 = scmp.ne.s32.totalorder %s2166_s0, %s3340_s17 }
  0xaa   : > { %s3349_s18 = scalar_select %p2642_p5, 1, 0 }
  0xab   : > { %s3345_s9 = scalar_select %p2624_p13, 1, 0 }
  0xac   : > { %p2633_p11 = por %p3346_p3, %p3259_p4  ;;  %p3350_p10 = scmp.ne.s32.totalorder %s2118_s19, %s3341_s3 }
  0xad   : > { %p2658_p6 = por %p439_p7, %p73_p1  ;;  %p3355_p3 = scmp.ne.s32.totalorder %s2178_s7, %s2174_s16 }
  0xae   : > { %p2651_p0 = por %p3350_p10, %p3259_p4  ;;  %s465_s24 = sand.u32 1, %s2182_s5  }
  0xaf   : > { %s3353_s4 = scalar_select %p2658_p6, 1, 0 }
  0xb0   : > { %s3351_s28 = scalar_select %p2651_p0, 1, 0 }
  0xb1   : > { %3354 = sst [smem:[#allocation53_spill]] %s3353_s4  ;;  %p2665_p13 = por %p445_p8, %p3355_p3 }
  0xb2   : > { %3352 = sst [smem:[#allocation58_spill]] %s3351_s28  ;;  %s1409_s6 = sshll.u32 %s2186_s15, 3 }
  0xb3   : > { %s3356_s27 = scalar_select %p2665_p13, 1, 0 }
  0xb4   : > { %s1408_s21 = sshll.u32 %s465_s24, 3  ;;  %s3358_s3 = sld [smem:[#allocation67_spill]] }
  0xb5   : > { %3357 = sst [smem:[#allocation43_spill]] %s3356_s27  ;;  %s469_s12 = scalar_lea.vmem [#allocation6], %s1408_s21 }
  0xb6   : > { %s477_s22 = sshll.u32 %s469_s12, 4  ;;  %p3359_p1 = scmp.lt.s32.totalorder %s2186_s15, 4  ;;  %s478_s22 = int_to_ptr.vmem [resolvable:$true] %s477_s22 }
  0xb7   : > { %s466_s20 = scalar_lea.sflag [#allocation7], %s465_s24 }
  0xb8   : > { %p2678_p7 = pnand %p3359_p1, %p2611_p2 }
  0xba   : > { %s473_s26 = scalar_lea.hbm %s3358_s3, %s1409_s6  ;;  %p1834_p12 = pneg %p2678_p7 }
  0xbb   : > { %s475_s8 = sshll.u32 %s473_s26, 4  ;;  %s1837_s6 = scalar_lea.hbm %s3358_s3, 32  ;;  %s476_s8 = int_to_ptr.hbm [resolvable:$true] %s475_s8 }
  0xbc   : > { %s1830_s5 = sshra.s32 %s476_s8, 4  ;;  %s1831_s5 = int_to_ptr.hbm [resolvable:$true] %s1830_s5 }
  0xbd   : > { %s1832_s27 = scalar_lea.hbm %s1831_s5, 8  ;;  %p1838_p2 = scmp.lt.s32.totalorder %s1831_s5, %s3358_s3 }
  0xbe   : > { %p1833_p8 = scmp.ne.s32.totalorder %s1831_s5, %s1832_s27  ;;  %p1839_p1 = scmp.lt.s32.totalorder %s1837_s6, %s1832_s27 }
  0xc0   : > { %p1835_p10 = pnand %p1834_p12, %p1833_p8  ;;  %p1840_p4 = por %p1839_p1, %p1838_p2 }
  0xc2   : > { %p1836_p3 = pneg %p1835_p10 }
  0xc4   : > { %p1841_p13 = pnand %p1840_p4, %p1836_p3 }
  0xc6   : > { %1844 = shalt.err (!%p1841_p13)
}
  0xc7   : > { %s3361_s24 = sld [smem:[#allocation51_spill]]  ;;  %p3364_p8 = scmp.eq.s32.totalorder %s2186_s15, 0 }
  0xc8   : > { %s3362_s17 = sld [smem:[#allocation52_spill]]  ;;  %p3372_p2 = scmp.lt.s32.totalorder %s2186_s15, 4 }
  0xc9   : > { %s3363_s30 = sld [smem:[#allocation50_spill]] }
  0xca   : > { %1480 = dma.hbm_to_vmem [thread:$0]  (!%p2678_p7), %s476_s8, 128, %s478_s22, %s466_s20  }
  0xcb   : > { %s145_s5 = sld [smem:[#allocation3 + %s2186_s15]]  ;;  %p3366_p7 = scmp.eq.s32.totalorder %s2566_s11, 0 }
  0xcc   : > { %s146_s27 = sld [smem:[#allocation3 + %s2398_s13]]  ;;  %p3374_p1 = pmov %p3372_p2 }
  0xcd   : > { %s3368_s20 = sld [smem:[#allocation47_spill]] }
  0xce   : > { %p157_p4 = scmp.ne.s32.totalorder %s3362_s17, %s3361_s24  ;;  %s517_s29 = sand.u32 1, %s3362_s17  }
  0xcf   : > { %p163_p13 = scmp.ne.s32.totalorder %s3361_s24, %s3363_s30  ;;  %s1413_s12 = sshll.u32 %s517_s29, 7 }
  0xd0   : > { %p2701_p12 = por %p157_p4, %p3364_p8  ;;  %s3369_s22 = sld [smem:[#allocation48_spill]] }
  0xd1   : > { %p2707_p10 = por %p163_p13, %p3366_p7  ;;  %s3370_s23 = sld [smem:[#allocation46_spill]] }
  0xd2   : > { %s1453_s6 = scalar_select %p2701_p12, [#allocation3], [#allocation20] }
  0xd3   : > { %s1454_s21 = scalar_select %p2701_p12, %s2186_s15, 0 }
  0xd4   : > { %s147_s24 = ssub.s32 %s145_s5, %s146_s27  ;;  %s150_s30 = sadd.s32 1, %s3362_s17 }
  0xd5   : > { %p148_p3 = scmp.eq.s32.totalorder %s147_s24, 0  ;;  %s519_s29 = scalar_lea.vmem [#allocation11], %s1413_s12 }
  0xd6   : > { %s2717_s3 = sshll.u32 %s519_s29, 4  ;;  %s3482_s6 = smov (!%p3372_p2, %s1453_s6), [#allocation26] }
  0xd7   : > { %3371 = sst [smem:[#allocation50_spill]] %s2717_s3  ;;  %s3484_s17 = smov (!%p148_p3, %s3362_s17), %s150_s30 }
  0xd8   : > { %3373 = sst [smem:[#allocation64_spill]] %s3484_s17  ;;  %s3486_s21 = smov (!%p3374_p1, %s1454_s21), 0 }
  0xd9   : > { %p3375_p4 = pmov %p3374_p1  ;;  %s520_s5 = sld [smem:[%s3482_s6 + %s3486_s21]] }
  0xda   : > { %s2735_s27 = sld [smem:[#allocation4 + %s2186_s15]]  ;;  %p269_p8 = scmp.ne.s32.totalorder %s3369_s22, %s3368_s20 }
  0xdb   : > { %p2730_p13 = pnand %p3375_p4, %p2701_p12  ;;  %s2739_s12 = sld [smem:[#allocation4 + %s2398_s13]] }
  0xdc   : > { %p275_p7 = scmp.ne.s32.totalorder %s3368_s20, %s3370_s23  ;;  %s579_s30 = sand.u32 1, %s3369_s22  }
  0xdd   : > { %s3377_s4 = sld [smem:[#allocation70_spill]]  ;;  %p3378_p3 = scmp.eq.s32.totalorder %s2186_s15, 0 }
  0xde   : > { %p3380_p2 = scmp.eq.s32.totalorder %s2566_s11, 0  ;;  %s1419_s3 = sshll.u32 %s579_s30, 7 }
  0xdf   : > { %s1444_s24 = sshll.u32 %s520_s5, 7  ;;  %p2751_p12 = por %p269_p8, %p3378_p3 }
  0xe0   : > { %p2757_p1 = por %p275_p7, %p3380_p2  ;;  %p1864_p6 = pneg %p2730_p13 }
  0xe2   : > { %s3381_s21 = scalar_select %p2757_p1, 1, 0 }
  0xe3   : > { %s525_s26 = scalar_lea.hbm %s3377_s4, %s1444_s24  ;;  %s1867_s24 = scalar_lea.hbm %s3377_s4, 256 }
  0xe4   : > { %s526_s6 = sshll.u32 %s525_s26, 4  ;;  %3382 = sst [smem:[#allocation46_spill]] %s3381_s21  ;;  %s527_s6 = int_to_ptr.hbm [resolvable:$true] %s526_s6 }
  0xe5   : > { %s1860_s20 = sshra.s32 %s527_s6, 4  ;;  %s1861_s20 = int_to_ptr.hbm [resolvable:$true] %s1860_s20 }
  0xe6   : > { %s1862_s23 = scalar_lea.hbm %s1861_s20, 128  ;;  %p1868_p8 = scmp.lt.s32.totalorder %s1861_s20, %s3377_s4 }
  0xe7   : > { %p1863_p4 = scmp.ne.s32.totalorder %s1861_s20, %s1862_s23  ;;  %p1869_p7 = scmp.lt.s32.totalorder %s1867_s24, %s1862_s23 }
  0xe9   : > { %p1865_p0 = pnand %p1864_p6, %p1863_p4  ;;  %p1870_p3 = por %p1869_p7, %p1868_p8 }
  0xeb   : > { %p1866_p5 = pneg %p1865_p0 }
  0xed   : > { %p1871_p2 = pnand %p1870_p3, %p1866_p5 }
  0xef   : > { %1874 = shalt.err (!%p1871_p2)
}
  0xf0   : > { %s3383_s30 = scalar_lea.sflag [#allocation10], %s2416_s2  ;;  %s3384_s19 = sld [smem:[#allocation50_spill]] }
  0xf1   : > { %s3386_s16 = sld [smem:[#allocation41_spill]]  ;;  %s259_s23 = ssub.s32 %s2735_s27, %s2739_s12 }
  0xf2   : > { %s3387_s20 = sld [smem:[#allocation42_spill]]  ;;  %s262_s17 = sadd.s32 1, %s3369_s22 }
  0xf3   : > { %s3388_s5 = sld [smem:[#allocation40_spill]]  ;;  %p260_p0 = scmp.eq.s32.totalorder %s259_s23, 0 }
  0xf4   : > { %s1460_s24 = scalar_select %p2751_p12, %s2186_s15, 0 }
  0xf5   : > { %s3488_s22 = smov (!%p260_p0, %s3369_s22), %s262_s17  ;;  %p3390_p6 = scmp.lt.s32.totalorder %s2186_s15, 4 }
  0xf6   : > { %s3385_s21 = int_to_ptr.vmem [resolvable:$true] %s3384_s19  ;;  %3389 = sst [smem:[#allocation65_spill]] %s3488_s22 }
  0xf7   : > { %1490 = dma.hbm_to_vmem [thread:$0]  (!%p2730_p13), %s527_s6, 2048, %s3385_s21, %s3383_s30, %s3328_s14, %s3328_s14, %s3327_s10  }
  0xf8   : > { %s1459_s19 = scalar_select %p2751_p12, [#allocation4], [#allocation22] }
  0xf9   : > { %p3391_p5 = pmov %p3390_p6  ;;  %s581_s6 = scalar_lea.vmem [#allocation14], %s1419_s3 }
  0xfa   : > { %s3490_s19 = smov (!%p3390_p6, %s1459_s19), [#allocation28]  ;;  %s2793_s21 = sshll.u32 %s581_s6, 4 }
  0xfb   : > { %s3492_s24 = smov (!%p3391_p5, %s1460_s24), 0  ;;  %3392 = sst [smem:[#allocation50_spill]] %s2793_s21 }
  0xfc   : > { %p3393_p13 = pmov %p3391_p5  ;;  %s582_s12 = sld [smem:[%s3490_s19 + %s3492_s24]] }
  0xfd   : > { %s2805_s29 = sld [smem:[#allocation4 + %s2186_s15]]  ;;  %p381_p8 = scmp.ne.s32.totalorder %s3387_s20, %s3386_s16 }
  0xfe   : > { %p2799_p4 = pnand %p3393_p13, %p2751_p12  ;;  %s370_s26 = sld [smem:[#allocation4 + %s2398_s13]] }
  0xff   : > { %p387_p7 = scmp.ne.s32.totalorder %s3386_s16, %s3388_s5  ;;  %s3395_s17 = sld [smem:[#allocation74_spill]] }
 0x100   : > { %p3397_p3 = scmp.eq.s32.totalorder %s2186_s15, 0  ;;  %p3399_p12 = scmp.eq.s32.totalorder %s2566_s11, 0 }
 0x101   : > { %s641_s24 = sand.u32 1, %s3387_s20   ;;  %p1894_p5 = pneg %p2799_p4 }
 0x102   : > { %s1446_s30 = sshll.u32 %s582_s12, 7  ;;  %p2817_p2 = por %p381_p8, %p3397_p3 }
 0x103   : > { %p2823_p0 = por %p387_p7, %p3399_p12 }
 0x105   : > { %s3396_s6 = smov %s3395_s17  ;;  %s587_s4 = scalar_lea.hbm %s3395_s17, %s1446_s30 }
 0x106   : > { %s588_s22 = sshll.u32 %s587_s4, 4  ;;  %s1897_s30 = scalar_lea.hbm %s3396_s6, 256  ;;  %s589_s22 = int_to_ptr.hbm [resolvable:$true] %s588_s22 }
 0x107   : > { %s1890_s21 = sshra.s32 %s589_s22, 4  ;;  %s1891_s21 = int_to_ptr.hbm [resolvable:$true] %s1890_s21 }
 0x108   : > { %s1892_s16 = scalar_lea.hbm %s1891_s21, 128  ;;  %p1898_p8 = scmp.lt.s32.totalorder %s1891_s21, %s3396_s6 }
 0x109   : > { %p1893_p6 = scmp.ne.s32.totalorder %s1891_s21, %s1892_s16  ;;  %p1899_p7 = scmp.lt.s32.totalorder %s1897_s30, %s1892_s16 }
 0x10b   : > { %p1895_p13 = pnand %p1894_p5, %p1893_p6  ;;  %p1900_p3 = por %p1899_p7, %p1898_p8 }
 0x10d   : > { %p1896_p1 = pneg %p1895_p13 }
 0x10f   : > { %p1901_p12 = pnand %p1900_p3, %p1896_p1 }
 0x111   : > { %1904 = shalt.err (!%p1901_p12)
}
 0x112   : > { %s3401_s3 = scalar_lea.sflag [#allocation13], %s2416_s2  ;;  %s3402_s17 = sld [smem:[#allocation50_spill]] }
 0x113   : > { %s371_s21 = ssub.s32 %s2805_s29, %s370_s26  ;;  %s374_s27 = sadd.s32 1, %s3387_s20 }
 0x114   : > { %p372_p1 = scmp.eq.s32.totalorder %s371_s21, 0  ;;  %s1425_s16 = sshll.u32 %s641_s24, 7 }
 0x115   : > { %s1465_s5 = scalar_select %p2817_p2, [#allocation4], [#allocation24] }
 0x116   : > { %s3494_s20 = smov (!%p372_p1, %s3387_s20), %s374_s27  ;;  %p3404_p6 = scmp.lt.s32.totalorder %s2186_s15, 4 }
 0x117   : > { %s1466_s12 = scalar_select %p2817_p2, %s2186_s15, 0 }
 0x118   : > { %s3403_s13 = int_to_ptr.vmem [resolvable:$true] %s3402_s17  ;;  %s3496_s5 = smov (!%p3404_p6, %s1465_s5), [#allocation30] }
 0x119   : > { %1500 = dma.hbm_to_vmem [thread:$0]  (!%p2799_p4), %s589_s22, 2048, %s3403_s13, %s3401_s3, %s3328_s14, %s3328_s14, %s3327_s10  }
 0x11a   : > { %p3405_p5 = pmov %p3404_p6  ;;  %s643_s22 = scalar_lea.vmem [#allocation17], %s1425_s16 }
 0x11b   : > { %s652_s29 = sshll.u32 %s643_s22, 4  ;;  %s3408_s23 = sld [smem:[#allocation78_spill]]  ;;  %s653_s29 = int_to_ptr.vmem [resolvable:$true] %s652_s29 }
 0x11c   : > { %s3498_s12 = smov (!%p3405_p5, %s1466_s12), 0  ;;  %p3406_p13 = pmov %p3405_p5 }
 0x11d   : > { %s644_s13 = sld [smem:[%s3496_s5 + %s3498_s12]] }
 0x11e   : > { %p2863_p8 = pnand %p3406_p13, %p2817_p2 }
 0x120   : > { %p1924_p2 = pneg %p2863_p8 }
 0x121   : > { %s3409_s3 = smov %s3408_s23 }
 0x122   : > { %s1927_s16 = scalar_lea.hbm %s3409_s3, 256 }
 0x123   : > { %s1448_s26 = sshll.u32 %s644_s13, 7 }
 0x124   : > { %s649_s17 = scalar_lea.hbm %s3408_s23, %s1448_s26 }
 0x125   : > { %s650_s21 = sshll.u32 %s649_s17, 4  ;;  %s651_s21 = int_to_ptr.hbm [resolvable:$true] %s650_s21 }
 0x126   : > { %s1920_s27 = sshra.s32 %s651_s21, 4  ;;  %s1921_s27 = int_to_ptr.hbm [resolvable:$true] %s1920_s27 }
 0x127   : > { %s1922_s28 = scalar_lea.hbm %s1921_s27, 128  ;;  %p1928_p12 = scmp.lt.s32.totalorder %s1921_s27, %s3409_s3 }
 0x128   : > { %p1923_p4 = scmp.ne.s32.totalorder %s1921_s27, %s1922_s28  ;;  %p1929_p1 = scmp.lt.s32.totalorder %s1927_s16, %s1922_s28 }
 0x12a   : > { %p1925_p7 = pnand %p1924_p2, %p1923_p4  ;;  %p1930_p6 = por %p1929_p1, %p1928_p12 }
 0x12c   : > { %p1926_p3 = pneg %p1925_p7 }
 0x12e   : > { %p1931_p5 = pnand %p1930_p6, %p1926_p3 }
 0x130   : > { %1934 = shalt.err (!%p1931_p5)
}
 0x131   : > { %s3410_s22 = scalar_lea.sflag [#allocation16], %s2416_s2  ;;  %672 = sbr.rel (%p2444_p9) target bundleno = 1245 (0x4dd), region = 72 }
 0x132   : > { %1510 = dma.hbm_to_vmem [thread:$0]  (!%p2863_p8), %s651_s21, 2048, %s653_s29, %s3410_s22, %s3328_s14, %s3328_s14, %s3327_s10  }
 0x133   : > { %s2888_s6 = sand.u32 (!%p2444_p9), 1, %s2178_s7   ;;  %p3412_p13 = scmp.ne.s32.totalorder (!%p2444_p9), %s3345_s9, 0 }
 0x134   : > { %s1429_s24 = sshll.u32 (!%p2444_p9), %s2888_s6, 3  ;;  %s675_s4 = scalar_lea.sflag (!%p2444_p9), [#allocation7], %s2888_s6 }
 0x135   : > { %s2894_s30 = scalar_lea.vmem (!%p2444_p9), [#allocation6], %s1429_s24 }
 0x136   : > { %2069 = dma.done.wait (%p3412_p13), %s675_s4, 128  }
 0x137   : > { %2071 = vsyncadd (%p3412_p13), %s675_s4, 4294967168  ;;  %s684_s2 = sand.u32 1, %s2566_s11   ;;  %s686_s14 = sand.u32 1, %s2166_s0  }
 0x138   : > { %s1430_s10 = sshll.u32 %s686_s14, 7  ;;  %s685_s29 = scalar_lea.sflag [#allocation10], %s684_s2 }
 0x139   : > { %s2902_s23 = scalar_lea.vmem [#allocation9], %s1430_s10 }
 0x13a   : > { %2073 = dma.done.wait (%p2633_p11), %s685_s29, 2048  }
 0x13b   : > { %2075 = vsyncadd (%p2633_p11), %s685_s29, 4294965248  ;;  %s3413_s17 = sld [smem:[#allocation51_spill]] }
 0x141   : > { %s696_s21 = sand.u32 1, %s3413_s17  }
 0x142   : > { %s1431_s27 = sshll.u32 %s696_s21, 7 }
 0x143   : > { %s2909_s9 = scalar_lea.vmem [#allocation11], %s1431_s27 }
 0x144   : > { %2077 = dma.done.wait (%p2707_p10), %s685_s29, 2048  }
 0x145   : > { %2079 = vsyncadd (%p2707_p10), %s685_s29, 4294965248  ;;  %s706_s28 = sand.u32 1, %s2142_s25   ;;  %s705_s16 = scalar_lea.sflag [#allocation13], %s684_s2 }
 0x146   : > { %s1432_s5 = sshll.u32 %s706_s28, 7  ;;  %p3414_p9 = scmp.ne.s32.totalorder %s3349_s18, 0 }
 0x147   : > { %s2916_s12 = scalar_lea.vmem [#allocation12], %s1432_s5 }
 0x148   : > { %2081 = dma.done.wait (%p3414_p9), %s705_s16, 2048  }
 0x149   : > { %2083 = vsyncadd (%p3414_p9), %s705_s16, 4294965248  ;;  %s3415_s1 = sld [smem:[#allocation47_spill]] }
 0x14a   : > { %s3416_s13 = sld [smem:[#allocation46_spill]] }
 0x14f   : > { %s716_s22 = sand.u32 1, %s3415_s1  }
 0x150   : > { %s1433_s26 = sshll.u32 %s716_s22, 7  ;;  %p3417_p11 = scmp.ne.s32.totalorder %s3416_s13, 0 }
 0x151   : > { %s2923_s4 = scalar_lea.vmem [#allocation14], %s1433_s26 }
 0x152   : > { %2085 = dma.done.wait (%p3417_p11), %s705_s16, 2048  }
 0x153   : > { %2087 = vsyncadd (%p3417_p11), %s705_s16, 4294965248  ;;  %s3418_s8 = sld [smem:[#allocation44_spill]]  ;;  %s725_s17 = scalar_lea.sflag [#allocation16], %s684_s2 }
 0x154   : > { %s3419_s14 = sld [smem:[#allocation58_spill]] }
 0x159   : > { %s726_s10 = sand.u32 1, %s3418_s8  }
 0x15a   : > { %s1434_s29 = sshll.u32 %s726_s10, 7  ;;  %p3420_p10 = scmp.ne.s32.totalorder %s3419_s14, 0 }
 0x15b   : > { %s2930_s21 = scalar_lea.vmem [#allocation15], %s1434_s29 }
 0x15c   : > { %2089 = dma.done.wait (%p3420_p10), %s725_s17, 2048  }
 0x15d   : > { %2091 = vsyncadd (%p3420_p10), %s725_s17, 4294965248  ;;  %s3421_s18 = sld [smem:[#allocation41_spill]] }
 0x163   : > { %s736_s27 = sand.u32 1, %s3421_s18  }
 0x164   : > { %s1435_s28 = sshll.u32 %s736_s27, 7 }
 0x165   : > { %s2937_s5 = scalar_lea.vmem [#allocation17], %s1435_s28 }
 0x166   : > { %2093 = dma.done.wait (%p2823_p0), %s725_s17, 2048  }
 0x167   : > { %2095 = vsyncadd (%p2823_p0), %s725_s17, 4294965248  ;;  %s855_s2 = sld [smem:[#allocation4 + %s2566_s11]]  ;;  %v888_v0 = vld [vmem:[%s2902_s23 + $0x78] sm:$0xff]  ;;  %v887_v1 = vld [vmem:[%s2902_s23 + $0x70] sm:$0xff] }
 0x168   : > { %s861_s16 = sld [smem:[#allocation4 + %s2566_s11]]  ;;  %893 = vmatpush.msra.mxu0 %v888_v0  ;;  %v886_v2 = vld [vmem:[%s2902_s23 + $0x68] sm:$0xff]  ;;  %v885_v3 = vld [vmem:[%s2902_s23 + $0x60] sm:$0xff]  ;;  %v931_v4 = vld [vmem:[%s2909_s9 + $0x78] sm:$0xff] }
 0x169   : > { %s867_s1 = sld [smem:[#allocation4 + %s2566_s11]]  ;;  %v884_v5 = vld [vmem:[%s2902_s23 + $0x58] sm:$0xff]  ;;  %936 = vmatpush.msra.mxu1 %v931_v4  ;;  %v930_v6 = vld [vmem:[%s2909_s9 + $0x70] sm:$0xff]  ;;  %v929_v7 = vld [vmem:[%s2909_s9 + $0x68] sm:$0xff] }
 0x16a   : > { %s2947_s13 = sld [smem:[#allocation5 + %s2566_s11]]  ;;  %894 = vmatpush.msra.mxu0 %v887_v1  ;;  %v883_v8 = vld [vmem:[%s2902_s23 + $0x50] sm:$0xff]  ;;  %v928_v9 = vld [vmem:[%s2909_s9 + $0x60] sm:$0xff]  ;;  %v882_v10 = vld [vmem:[%s2902_s23 + $0x48] sm:$0xff] }
 0x16b   : > { %s837_s22 = sld [smem:[#allocation3 + %s2566_s11]]  ;;  %937 = vmatpush.msra.mxu1 %v930_v6  ;;  %v927_v11 = vld [vmem:[%s2909_s9 + $0x58] sm:$0xff]  ;;  %v881_v12 = vld [vmem:[%s2902_s23 + $0x40] sm:$0xff]  ;;  %v926_v13 = vld [vmem:[%s2909_s9 + $0x50] sm:$0xff] }
 0x16c   : > { %s3423_s17 = sld [smem:[#allocation77_spill]]  ;;  %895 = vmatpush.msra.mxu0 %v886_v2  ;;  %v880_v14 = vld [vmem:[%s2902_s23 + $0x38] sm:$0xff]  ;;  %v925_v15 = vld [vmem:[%s2909_s9 + $0x48] sm:$0xff]  ;;  %v879_v16 = vld [vmem:[%s2902_s23 + $0x30] sm:$0xff] }
 0x16d   : > { %p856_p8 = scmp.lt.s32.totalorder %s855_s2, 1  ;;  %s3424_s19 = sld [smem:[#allocation79_spill]]  ;;  %938 = vmatpush.msra.mxu1 %v929_v7  ;;  %v924_v17 = vld [vmem:[%s2909_s9 + $0x40] sm:$0xff]  ;;  %v878_v18 = vld [vmem:[%s2902_s23 + $0x28] sm:$0xff]  ;;  %v923_v19 = vld [vmem:[%s2909_s9 + $0x38] sm:$0xff] }
 0x16e   : > { %p862_p0 = scmp.lt.s32.totalorder %s861_s16, 1  ;;  %896 = vmatpush.msra.mxu0 %v885_v3  ;;  %s3425_s29 = sld [smem:[#allocation69_spill]]  ;;  %v877_v20 = vld [vmem:[%s2902_s23 + $0x20] sm:$0xff]  ;;  %v922_v21 = vld [vmem:[%s2909_s9 + $0x30] sm:$0xff]  ;;  %v876_v22 = vld [vmem:[%s2902_s23 + $0x18] sm:$0xff] }
 0x16f   : > { %s3500_s2 = smov (!%p856_p8, %s855_s2), 1  ;;  %p868_p4 = scmp.lt.s32.totalorder %s867_s1, 1  ;;  %939 = vmatpush.msra.mxu1 %v928_v9  ;;  %v921_v23 = vld [vmem:[%s2909_s9 + $0x28] sm:$0xff]  ;;  %v875_v24 = vld [vmem:[%s2902_s23 + $0x10] sm:$0xff]  ;;  %v920_v25 = vld [vmem:[%s2909_s9 + $0x20] sm:$0xff] }
 0x170   : > { %s3502_s16 = smov (!%p862_p0, %s861_s16), 1  ;;  %897 = vmatpush.msra.mxu0 %v884_v5  ;;  %v874_v26 = vld [vmem:[%s2902_s23 + $0x8] sm:$0xff]  ;;  %v919_v27 = vld [vmem:[%s2909_s9 + $0x18] sm:$0xff]  ;;  %v873_v28 = vld [vmem:[%s2902_s23] sm:$0xff]  ;;  %s843_s27 = sld [smem:[#allocation3 + %s2566_s11]] }
 0x171   : > { %p838_p2 = scmp.lt.s32.totalorder %s837_s22, 1  ;;  %s3504_s1 = smov (!%p868_p4, %s867_s1), 1  ;;  %940 = vmatpush.msra.mxu1 %v927_v11  ;;  %v872_v29 = vld [vmem:[%s2894_s30] sm:$0xff]  ;;  %v917_v31 = vld [vmem:[%s2909_s9 + $0x8] sm:$0xff]  ;;  %v916_v32 = vld [vmem:[%s2909_s9] sm:$0xff] }
 0x172   : > { %s864_s18 = scalar_lea.vmem %s3423_s17, %s3502_s16  ;;  %898 = vmatpush.msra.mxu0 %v883_v8  ;;  %s3427_s8 = sld [smem:[#allocation71_spill]]  ;;  %v918_v30 = vld [vmem:[%s2909_s9 + $0x10] sm:$0xff]  ;;  %v974_v33 = vld [vmem:[%s2916_s12 + $0x78] sm:$0xff]  ;;  %v972_v35 = vld [vmem:[%s2916_s12 + $0x68] sm:$0xff] }
 0x173   : > { %s3506_s22 = smov (!%p838_p2, %s837_s22), 1  ;;  %s870_s26 = scalar_lea.vmem %s3424_s19, %s3504_s1  ;;  %941 = vmatpush.msra.mxu1 %v926_v13  ;;  %v973_v34 = vld [vmem:[%s2916_s12 + $0x70] sm:$0xff]  ;;  %979 = vmatpush.msra.mxu2 %v974_v33  ;;  %v971_v36 = vld [vmem:[%s2916_s12 + $0x60] sm:$0xff]  ;;  %v970_v37 = vld [vmem:[%s2916_s12 + $0x58] sm:$0xff] }
 0x174   : > { %s840_s17 = scalar_lea.vmem %s3425_s29, %s3506_s22  ;;  %899 = vmatpush.msra.mxu0 %v882_v10  ;;  %v969_v38 = vld [vmem:[%s2916_s12 + $0x50] sm:$0xff]  ;;  %v968_v39 = vld [vmem:[%s2916_s12 + $0x48] sm:$0xff]  ;;  %v967_v40 = vld [vmem:[%s2916_s12 + $0x40] sm:$0xff]  ;;  %s849_s10 = sld [smem:[#allocation3 + %s2566_s11]] }
 0x175   : > { %942 = vmatpush.msra.mxu1 %v925_v15  ;;  %980 = vmatpush.msra.mxu2 %v973_v34  ;;  %v966_v41 = vld [vmem:[%s2916_s12 + $0x38] sm:$0xff]  ;;  %v965_v42 = vld [vmem:[%s2916_s12 + $0x30] sm:$0xff]  ;;  %v964_v43 = vld [vmem:[%s2916_s12 + $0x28] sm:$0xff]  ;;  %s3428_s19 = sld [smem:[#allocation73_spill]]  ;;  %s3048_s9 = scalar_lea.vmem [#allocation18], %s1429_s24 }
 0x176   : > { %900 = vmatpush.msra.mxu0 %v881_v12  ;;  %p844_p7 = scmp.lt.s32.totalorder %s843_s27, 1  ;;  %v963_v44 = vld [vmem:[%s2916_s12 + $0x20] sm:$0xff]  ;;  %v962_v45 = vld [vmem:[%s2916_s12 + $0x18] sm:$0xff]  ;;  %v1698_v46 = vld [vmem:[%s840_s17] ss:$0 sm:$0xff]  ;;  %p1437_p12 = scmp.ne.s32.totalorder %s2947_s13, 0 }
 0x177   : > { %943 = vmatpush.msra.mxu1 %v924_v17  ;;  %981 = vmatpush.msra.mxu2 %v972_v35  ;;  %v961_v51 = vld [vmem:[%s2916_s12 + $0x10] sm:$0xff]  ;;  %v960_v52 = vld [vmem:[%s2916_s12 + $0x8] sm:$0xff]  ;;  %v959_v53 = vld [vmem:[%s2916_s12] sm:$0xff] }
 0x178   : > { %901 = vmatpush.msra.mxu0 %v880_v14  ;;  %s3508_s27 = smov (!%p844_p7, %s843_s27), 1 }
 0x179   : > { %944 = vmatpush.msra.mxu1 %v923_v19  ;;  %s846_s23 = scalar_lea.vmem %s3427_s8, %s3508_s27  ;;  %982 = vmatpush.msra.mxu2 %v971_v36 }
 0x17a   : > { %902 = vmatpush.msra.mxu0 %v879_v16  ;;  %p850_p3 = scmp.lt.s32.totalorder %s849_s10, 1  ;;  %v1699_v54 = vld [vmem:[%s846_s23] ss:$0 sm:$0xff] }
 0x17b   : > { %945 = vmatpush.msra.mxu1 %v922_v21  ;;  %983 = vmatpush.msra.mxu2 %v970_v37 }
 0x17c   : > { %903 = vmatpush.msra.mxu0 %v878_v18  ;;  %s3510_s10 = smov (!%p850_p3, %s849_s10), 1 }
 0x17d   : > { %946 = vmatpush.msra.mxu1 %v921_v23  ;;  %984 = vmatpush.msra.mxu2 %v969_v38  ;;  %s852_s30 = scalar_lea.vmem %s3428_s19, %s3510_s10 }
 0x17e   : > { %904 = vmatpush.msra.mxu0 %v877_v20  ;;  %v1700_v59 = vld [vmem:[%s852_s30] ss:$0 sm:$0xff] }
 0x17f   : > { %947 = vmatpush.msra.mxu1 %v920_v25  ;;  %985 = vmatpush.msra.mxu2 %v968_v39 }
 0x180   : > { %905 = vmatpush.msra.mxu0 %v876_v22 }
 0x181   : > { %948 = vmatpush.msra.mxu1 %v919_v27  ;;  %986 = vmatpush.msra.mxu2 %v967_v40 }
 0x182   : > { %906 = vmatpush.msra.mxu0 %v875_v24 }
 0x183   : > { %949 = vmatpush.msra.mxu1 %v918_v30  ;;  %987 = vmatpush.msra.mxu2 %v966_v41 }
 0x184   : > { %907 = vmatpush.msra.mxu0 %v874_v26 }
 0x185   : > { %950 = vmatpush.msra.mxu1 %v917_v31  ;;  %988 = vmatpush.msra.mxu2 %v965_v42 }
 0x186   : > { %908 = vmatpush.msra.mxu0 %v873_v28 }
 0x187   : > { %909 = vmatmul.f32.vlgmr.msra.gmra.mxu0 %v872_v29  ;;  %951 = vmatpush.msra.mxu1 %v916_v32 }
 0x188   : > { %989 = vmatpush.msra.mxu2 %v964_v43 }
 0x18a   : > { %990 = vmatpush.msra.mxu2 %v963_v44 }
 0x18c   : > { %991 = vmatpush.msra.mxu2 %v962_v45 }
 0x18e   : > { %992 = vmatpush.msra.mxu2 %v961_v51 }
 0x190   : > { %993 = vmatpush.msra.mxu2 %v960_v52 }
 0x192   : > { %994 = vmatpush.msra.mxu2 %v959_v53 }
 0x204   : > { %v910_v47 = vpop.f32.mrf.mxu0 }
 0x205   : > { %v911_v48 = vadd.f32 %v1698_v46, %v910_v47 }
 0x207   : > { %vm913_vm0 = vcmp.gt.f32.partialorder %v911_v48, 0.0  ;;  %v914_v49 = vmul.f32 0.01, %v911_v48 }
 0x209   : > { %v915_v50 = vsel %vm913_vm0, %v911_v48, %v914_v49 }
 0x20a   : > { %952 = vmatmul.f32.vlgmr.msra.gmra.mxu1 %v915_v50 }
 0x287   : > { %v953_v55 = vpop.f32.mrf.mxu1 }
 0x288   : > { %v954_v56 = vadd.f32 %v1699_v54, %v953_v55 }
 0x28a   : > { %vm956_vm1 = vcmp.gt.f32.partialorder %v954_v56, 0.0  ;;  %v957_v57 = vmul.f32 0.01, %v954_v56 }
 0x28c   : > { %v958_v58 = vsel %vm956_vm1, %v954_v56, %v957_v57 }
 0x28d   : > { %995 = vmatmul.f32.vlgmr.msra.gmra.mxu2 %v958_v58 }
 0x30d   : > { %1003 = sbr.rel (%p1437_p12) target bundleno = 788 (0x314), region = 104 }
 0x310   : > { %v996_v60 = vpop.f32.mrf.mxu2 }
 0x311   : > { %v3044_v61 = vadd.f32 %v1700_v59, %v996_v60 }
 0x313   : > { %1004 = vst [vmem:[%s3048_s9] sm:$0xff] %v3044_v61 }
 0x314 PF: > { %p1438_p1 = scmp.eq.s32.totalorder %s2947_s13, 0 }
 0x316   : > { %1008 = sbr.rel (%p1438_p1) target bundleno = 1224 (0x4c8), region = 108 }
 0x31b   : > { %v1024_v62 = vld [vmem:[%s2923_s4 + $0x78] sm:$0xff]  ;;  %v1023_v63 = vld [vmem:[%s2923_s4 + $0x70] sm:$0xff]  ;;  %v1022_v0 = vld [vmem:[%s2923_s4 + $0x68] sm:$0xff] }
 0x31c   : > { %1029 = vmatpush.msra.mxu0 %v1024_v62  ;;  %v1021_v1 = vld [vmem:[%s2923_s4 + $0x60] sm:$0xff]  ;;  %v1067_v2 = vld [vmem:[%s2930_s21 + $0x78] sm:$0xff]  ;;  %v1066_v3 = vld [vmem:[%s2930_s21 + $0x70] sm:$0xff] }
 0x31d   : > { %v1020_v4 = vld [vmem:[%s2923_s4 + $0x58] sm:$0xff]  ;;  %1072 = vmatpush.msra.mxu1 %v1067_v2  ;;  %v1065_v5 = vld [vmem:[%s2930_s21 + $0x68] sm:$0xff]  ;;  %v1019_v6 = vld [vmem:[%s2923_s4 + $0x50] sm:$0xff] }
 0x31e   : > { %1030 = vmatpush.msra.mxu0 %v1023_v63  ;;  %v1064_v7 = vld [vmem:[%s2930_s21 + $0x60] sm:$0xff]  ;;  %v1018_v8 = vld [vmem:[%s2923_s4 + $0x48] sm:$0xff]  ;;  %v1063_v9 = vld [vmem:[%s2930_s21 + $0x58] sm:$0xff] }
 0x31f   : > { %1073 = vmatpush.msra.mxu1 %v1066_v3  ;;  %v1017_v10 = vld [vmem:[%s2923_s4 + $0x40] sm:$0xff]  ;;  %v1062_v11 = vld [vmem:[%s2930_s21 + $0x50] sm:$0xff]  ;;  %v1016_v12 = vld [vmem:[%s2923_s4 + $0x38] sm:$0xff] }
 0x320   : > { %1031 = vmatpush.msra.mxu0 %v1022_v0  ;;  %v1061_v13 = vld [vmem:[%s2930_s21 + $0x48] sm:$0xff]  ;;  %v1015_v14 = vld [vmem:[%s2923_s4 + $0x30] sm:$0xff]  ;;  %v1060_v15 = vld [vmem:[%s2930_s21 + $0x40] sm:$0xff] }
 0x321   : > { %1074 = vmatpush.msra.mxu1 %v1065_v5  ;;  %v1014_v16 = vld [vmem:[%s2923_s4 + $0x28] sm:$0xff]  ;;  %v1059_v17 = vld [vmem:[%s2930_s21 + $0x38] sm:$0xff]  ;;  %v1013_v18 = vld [vmem:[%s2923_s4 + $0x20] sm:$0xff] }
 0x322   : > { %1032 = vmatpush.msra.mxu0 %v1021_v1  ;;  %v1058_v19 = vld [vmem:[%s2930_s21 + $0x30] sm:$0xff]  ;;  %v1012_v20 = vld [vmem:[%s2923_s4 + $0x18] sm:$0xff]  ;;  %v1057_v21 = vld [vmem:[%s2930_s21 + $0x28] sm:$0xff] }
 0x323   : > { %1075 = vmatpush.msra.mxu1 %v1064_v7  ;;  %v1011_v22 = vld [vmem:[%s2923_s4 + $0x10] sm:$0xff]  ;;  %v1056_v23 = vld [vmem:[%s2930_s21 + $0x20] sm:$0xff]  ;;  %v1010_v24 = vld [vmem:[%s2923_s4 + $0x8] sm:$0xff] }
 0x324   : > { %1033 = vmatpush.msra.mxu0 %v1020_v4  ;;  %v1055_v25 = vld [vmem:[%s2930_s21 + $0x18] sm:$0xff]  ;;  %v1009_v26 = vld [vmem:[%s2923_s4] sm:$0xff]  ;;  %v1054_v27 = vld [vmem:[%s2930_s21 + $0x10] sm:$0xff]  ;;  %s3429_s4 = sld [smem:[#allocation75_spill]] }
 0x325   : > { %1076 = vmatpush.msra.mxu1 %v1063_v9  ;;  %v1053_v28 = vld [vmem:[%s2930_s21 + $0x8] sm:$0xff]  ;;  %v1052_v29 = vld [vmem:[%s2930_s21] sm:$0xff]  ;;  %v1110_v30 = vld [vmem:[%s2937_s5 + $0x78] sm:$0xff] }
 0x326   : > { %1034 = vmatpush.msra.mxu0 %v1019_v6  ;;  %v1109_v31 = vld [vmem:[%s2937_s5 + $0x70] sm:$0xff]  ;;  %1115 = vmatpush.msra.mxu2 %v1110_v30  ;;  %v1108_v32 = vld [vmem:[%s2937_s5 + $0x68] sm:$0xff]  ;;  %v1107_v33 = vld [vmem:[%s2937_s5 + $0x60] sm:$0xff] }
 0x327   : > { %1077 = vmatpush.msra.mxu1 %v1062_v11  ;;  %v1106_v34 = vld [vmem:[%s2937_s5 + $0x58] sm:$0xff]  ;;  %v1105_v35 = vld [vmem:[%s2937_s5 + $0x50] sm:$0xff]  ;;  %v1104_v36 = vld [vmem:[%s2937_s5 + $0x48] sm:$0xff] }
 0x328   : > { %1035 = vmatpush.msra.mxu0 %v1018_v8  ;;  %1116 = vmatpush.msra.mxu2 %v1109_v31  ;;  %v1103_v37 = vld [vmem:[%s2937_s5 + $0x40] sm:$0xff]  ;;  %v1102_v38 = vld [vmem:[%s2937_s5 + $0x38] sm:$0xff]  ;;  %v1101_v39 = vld [vmem:[%s2937_s5 + $0x30] sm:$0xff] }
 0x329   : > { %1078 = vmatpush.msra.mxu1 %v1061_v13  ;;  %v1100_v40 = vld [vmem:[%s2937_s5 + $0x28] sm:$0xff]  ;;  %v1099_v41 = vld [vmem:[%s2937_s5 + $0x20] sm:$0xff]  ;;  %v1098_v42 = vld [vmem:[%s2937_s5 + $0x18] sm:$0xff] }
 0x32a   : > { %1036 = vmatpush.msra.mxu0 %v1017_v10  ;;  %1117 = vmatpush.msra.mxu2 %v1108_v32  ;;  %s3430_s21 = scalar_lea.vmem %s3429_s4, %s3500_s2  ;;  %v1097_v48 = vld [vmem:[%s2937_s5 + $0x10] sm:$0xff]  ;;  %v1096_v49 = vld [vmem:[%s2937_s5 + $0x8] sm:$0xff]  ;;  %v1095_v50 = vld [vmem:[%s2937_s5] sm:$0xff] }
 0x32b   : > { %1079 = vmatpush.msra.mxu1 %v1060_v15  ;;  %v1701_v43 = vld [vmem:[%s3430_s21] ss:$0 sm:$0xff] }
 0x32c   : > { %1037 = vmatpush.msra.mxu0 %v1016_v12  ;;  %1118 = vmatpush.msra.mxu2 %v1107_v33  ;;  %v1702_v51 = vld [vmem:[%s864_s18] ss:$0 sm:$0xff] }
 0x32d   : > { %1080 = vmatpush.msra.mxu1 %v1059_v17  ;;  %v1703_v56 = vld [vmem:[%s870_s26] ss:$0 sm:$0xff] }
 0x32e   : > { %1038 = vmatpush.msra.mxu0 %v1015_v14  ;;  %1119 = vmatpush.msra.mxu2 %v1106_v34 }
 0x32f   : > { %1081 = vmatpush.msra.mxu1 %v1058_v19 }
 0x330   : > { %1039 = vmatpush.msra.mxu0 %v1014_v16  ;;  %1120 = vmatpush.msra.mxu2 %v1105_v35 }
 0x331   : > { %1082 = vmatpush.msra.mxu1 %v1057_v21 }
 0x332   : > { %1040 = vmatpush.msra.mxu0 %v1013_v18  ;;  %1121 = vmatpush.msra.mxu2 %v1104_v36 }
 0x333   : > { %1083 = vmatpush.msra.mxu1 %v1056_v23 }
 0x334   : > { %1041 = vmatpush.msra.mxu0 %v1012_v20  ;;  %1122 = vmatpush.msra.mxu2 %v1103_v37 }
 0x335   : > { %1084 = vmatpush.msra.mxu1 %v1055_v25 }
 0x336   : > { %1042 = vmatpush.msra.mxu0 %v1011_v22  ;;  %1123 = vmatpush.msra.mxu2 %v1102_v38 }
 0x337   : > { %1085 = vmatpush.msra.mxu1 %v1054_v27 }
 0x338   : > { %1043 = vmatpush.msra.mxu0 %v1010_v24  ;;  %1124 = vmatpush.msra.mxu2 %v1101_v39 }
 0x339   : > { %1086 = vmatpush.msra.mxu1 %v1053_v28 }
 0x33a   : > { %1044 = vmatpush.msra.mxu0 %v1009_v26  ;;  %1125 = vmatpush.msra.mxu2 %v1100_v40 }
 0x33b   : > { %1045 = vmatmul.f32.vlgmr.msra.gmra.mxu0 %v3044_v61  ;;  %1087 = vmatpush.msra.mxu1 %v1052_v29 }
 0x33c   : > { %1126 = vmatpush.msra.mxu2 %v1099_v41 }
 0x33e   : > { %1127 = vmatpush.msra.mxu2 %v1098_v42 }
 0x340   : > { %1128 = vmatpush.msra.mxu2 %v1097_v48 }
 0x342   : > { %1129 = vmatpush.msra.mxu2 %v1096_v49 }
 0x344   : > { %1130 = vmatpush.msra.mxu2 %v1095_v50 }
 0x3b8   : > { %v1046_v44 = vpop.f32.mrf.mxu0 }
 0x3b9   : > { %v1047_v45 = vadd.f32 %v1701_v43, %v1046_v44 }
 0x3bb   : > { %vm1049_vm2 = vcmp.gt.f32.partialorder %v1047_v45, 0.0  ;;  %v1050_v46 = vmul.f32 0.01, %v1047_v45 }
 0x3bd   : > { %v1051_v47 = vsel %vm1049_vm2, %v1047_v45, %v1050_v46 }
 0x3be   : > { %1088 = vmatmul.f32.vlgmr.msra.gmra.mxu1 %v1051_v47 }
 0x43b   : > { %v1089_v52 = vpop.f32.mrf.mxu1 }
 0x43c   : > { %v1090_v53 = vadd.f32 %v1702_v51, %v1089_v52 }
 0x43e   : > { %vm1092_vm3 = vcmp.gt.f32.partialorder %v1090_v53, 0.0  ;;  %v1093_v54 = vmul.f32 0.01, %v1090_v53 }
 0x440   : > { %v1094_v55 = vsel %vm1092_vm3, %v1090_v53, %v1093_v54 }
 0x441   : > { %1131 = vmatmul.f32.vlgmr.msra.gmra.mxu2 %v1094_v55 }
 0x4c4   : > { %v1132_v57 = vpop.f32.mrf.mxu2 }
 0x4c5   : > { %v1133_v58 = vadd.f32 %v1703_v56, %v1132_v57 }
 0x4c7   : > { %1135 = vst [vmem:[%s3048_s9] sm:$0xff] %v1133_v58 }
 0x4c8 PF: > { %s3433_s5 = sld [smem:[#allocation53_spill]]  ;;  %s1440_s16 = sshll.u32 %s2566_s11, 3 }
 0x4c9   : > { %s3434_s19 = sld [smem:[#allocation80_spill]]  ;;  %s1149_s22 = sshll.u32 %s3048_s9, 4  ;;  %s1150_s22 = int_to_ptr.vmem [resolvable:$true] %s1149_s22 }
 0x4ca   : > { %s1137_s24 = scalar_lea.sflag [#allocation8], %s2888_s6 }
 0x4ce   : > { %p3436_p5 = scmp.ne.s32.totalorder %s3433_s5, 0 }
 0x4cf   : > { %s3435_s12 = smov %s3434_s19  ;;  %s1147_s30 = scalar_lea.hbm %s3434_s19, %s1440_s16 }
 0x4d0   : > { %s1151_s17 = sshll.u32 %s1147_s30, 4  ;;  %s1970_s11 = scalar_lea.hbm %s3435_s12, 32  ;;  %s1152_s17 = int_to_ptr.hbm [resolvable:$true] %s1151_s17 }
 0x4d1   : > { %s1964_s1 = sshra.s32 %s1152_s17, 4  ;;  %s1965_s1 = int_to_ptr.hbm [resolvable:$true] %s1964_s1 }
 0x4d2   : > { %s1966_s26 = scalar_lea.hbm %s1965_s1, 8  ;;  %p1971_p11 = scmp.lt.s32.totalorder %s1965_s1, %s3435_s12 }
 0x4d3   : > { %p1967_p6 = scmp.ne.s32.totalorder %s1965_s1, %s1966_s26  ;;  %p1972_p10 = scmp.lt.s32.totalorder %s1970_s11, %s1966_s26 }
 0x4d5   : > { %p1968_p13 = pnand %p1967_p6, %p3436_p5  ;;  %p1973_p8 = por %p1972_p10, %p1971_p11 }
 0x4d7   : > { %p1969_p9 = pneg %p1968_p13 }
 0x4d9   : > { %p1974_p0 = pnand %p1973_p8, %p1969_p9 }
 0x4db   : > { %1977 = shalt.err (!%p1974_p0)
}
 0x4dc   : > { %1475 = dma.vmem_to_hbm [thread:$0]  (%p3436_p5), %s1150_s22, 128, %s1152_s17, %s1137_s24  }
 0x4dd PF: > { %s3437_s6 = sld [smem:[#allocation55_spill]]  ;;  %p1516_p4 = scmp.ge.s32.totalorder %s2186_s15, 2 }
 0x4de   : > { %s3438_s9 = sld [smem:[#allocation43_spill]] }
 0x4e3   : > { %s1163_s27 = sand.u32 1, %s3437_s6  }
 0x4e4   : > { %p3439_p2 = scmp.ne.s32.totalorder %s3438_s9, 0  ;;  %s1164_s23 = scalar_lea.sflag [#allocation8], %s1163_s27 }
 0x4e6   : > { %p1512_p7 = pnand %p1516_p4, %p3439_p2 }
 0x4e8   : > { %p1513_p3 = pneg %p1512_p7 }
 0x4ea   : > { %2097 = dma.done.wait (%p1513_p3), %s1164_s23, 128  }
 0x4eb   : > { %2099 = vsyncadd (%p1513_p3), %s1164_s23, 4294967168  ;;  %s3440_s15 = sld [smem:[#allocation57_spill]]  ;;  %s3456_s2 = smov %s3494_s20 }
 0x4ec   : > { %s3441_s1 = sld [smem:[#allocation41_spill]]  ;;  %s3461_s24 = smov %s2142_s25 }
 0x4ed   : > { %s3442_s9 = sld [smem:[#allocation42_spill]]  ;;  %s3464_s30 = smov %s2166_s0 }
 0x4ee   : > { %s3443_s18 = sld [smem:[#allocation44_spill]] }
 0x4ef   : > { %s3444_s19 = sld [smem:[#allocation45_spill]] }
 0x4f0   : > { %s3445_s10 = sld [smem:[#allocation62_spill]] }
 0x4f1   : > { %s3446_s21 = sld [smem:[#allocation47_spill]]  ;;  %p56_p12 = scmp.ge.s32.totalorder %s3440_s15, 6  }
 0x4f2   : > { %s3447_s22 = sld [smem:[#allocation48_spill]] }
 0x4f3   : > { %s3448_s23 = sld [smem:[#allocation65_spill]] }
 0x4f4   : > { %s3449_s29 = sld [smem:[#allocation49_spill]] }
 0x4f5   : > { %s3450_s26 = sld [smem:[#allocation61_spill]] }
 0x4f6   : > { %s3451_s27 = sld [smem:[#allocation51_spill]]  ;;  %s3459_s20 = smov %s3445_s10 }
 0x4f7   : > { %s3452_s28 = sld [smem:[#allocation52_spill]] }
 0x4f8   : > { %s3453_s5 = sld [smem:[#allocation64_spill]] }
 0x4f9   : > { %s3454_s16 = sld [smem:[#allocation54_spill]] }
 0x4fa   : > { %s3455_s17 = sld [smem:[#allocation59_spill]]  ;;  %s3462_s25 = smov %s3449_s29 }
 0x4fb   : > { %s3457_s4 = sld [smem:[#allocation56_spill]] }
 0x4fc   : > { %s3458_s11 = sld [smem:[#allocation63_spill]] }
 0x4fe   : > { %s3463_s29 = smov %s3453_s5  ;;  %58 = sbr.rel (!%p56_p12) target bundleno = 49 (0x31), region = 215 }
 0x4ff   : > { %s3465_s0 = smov %s3454_s16  ;;  %s3466_s16 = smov %s2178_s7 }
 0x501   : > { %s3467_s7 = smov %s3457_s4 }
 0x502   : > { %s3468_s5 = smov %s3458_s11 }
 0x503   :  { %1170 = vsyncpa [#allocation7], 1 }
 0x504   :  { %1172 = vsyncpa [#allocation7 + $0x1], 1 }
 0x505   :  { %1173 = vsyncpa [#allocation10], 1 }
 0x506   :  { %1175 = vsyncpa [#allocation10 + $0x1], 1 }
 0x507   :  { %1176 = vsyncpa [#allocation13], 1 }
 0x508   :  { %1178 = vsyncpa [#allocation13 + $0x1], 1 }
 0x509   :  { %1179 = vsyncpa [#allocation16], 1 }
 0x50a   :  { %1181 = vsyncpa [#allocation16 + $0x1], 1 }
 0x50b   :  { %1182 = vsyncpa [#allocation8], 1 }
 0x50c   :  { %1184 = vsyncpa [#allocation8 + $0x1], 1 }

</bundles_post_ra>
